<compile_context>
chip_gen: v7x
topology: tpu7x:2x2x1
jax: 0.10.0
libtpu: 0.0.40
codegen_flags: <defaults>
</compile_context>

<pallas_src>
import functools

import jax
import jax.numpy as jnp
from jax import lax
from jax.experimental import pallas as pl
from jax.experimental.pallas import tpu as pltpu


# ----------------------------------------------------------------------------
# In-kernel helpers
# ----------------------------------------------------------------------------
def _layer_norm(v, w, b, eps=1e-5):
    mu = jnp.mean(v, axis=-1, keepdims=True)
    d = v - mu
    var = jnp.mean(d * d, axis=-1, keepdims=True)
    return d * lax.rsqrt(var + eps) * w + b


def _mha(q_in, k_in, v_in, bias, wq_bd, wk_bd, wv_bd, wo_t, bo, *, heads, emb, scale):
    """Multi-head attention, faithful to the PyTorch SelfAttention module.

    q_in: (nb*lq, E) f32   k_in / v_in: (nb*lk, E) f32
    bias: (nb, lq, lk) f32 additive mask (0 or -1e20)
    wq_bd/wk_bd/wv_bd: (E, E) bf16 block-diagonal per-head projections
    wo_t: (E, E) bf16 fc_out weight (transposed), bo: (1, E) f32
    """
    nb, lq, lk = bias.shape
    dh = emb // heads

    # fused projections: one (rows, E) @ (E, E) bf16 matmul per Q/K/V
    q = jnp.dot(q_in.astype(jnp.bfloat16), wq_bd,
                preferred_element_type=jnp.float32) * scale      # scale folded into q
    k = jnp.dot(k_in.astype(jnp.bfloat16), wk_bd,
                preferred_element_type=jnp.float32)
    v = jnp.dot(v_in.astype(jnp.bfloat16), wv_bd,
                preferred_element_type=jnp.float32)

    ctx = []
    for h in range(heads):                                       # static, small H
        sl = slice(h * dh, (h + 1) * dh)
        qh = q[:, sl].reshape(nb, lq, dh).astype(jnp.bfloat16)
        kh = k[:, sl].reshape(nb, lk, dh).astype(jnp.bfloat16)
        vh = v[:, sl].reshape(nb, lk, dh).astype(jnp.bfloat16)
        # bias already hoisted; masked entries end ~-1e20 (torch: -1e20/sqrt(E)) --
        # both give prob 0 (or uniform for fully-masked rows) after max-subtraction.
        logits = jnp.einsum('bqd,bkd->bqk', qh, kh,
                            preferred_element_type=jnp.float32) + bias
        m = jnp.max(logits, axis=-1, keepdims=True)
        p = jnp.exp(logits - m)
        inv = pl.reciprocal(jnp.sum(p, axis=-1, keepdims=True), approx=True)
        attn = (p * inv).astype(jnp.bfloat16)
        ctx.append(jnp.einsum('bqk,bkd->bqd', attn, vh,
                              preferred_element_type=jnp.float32))
    # concat heads, then one (rows, E) @ (E, E) fc_out matmul
    ctx = jnp.concatenate(ctx, axis=-1).reshape(nb * lq, emb)
    return jnp.dot(ctx.astype(jnp.bfloat16), wo_t,
                   preferred_element_type=jnp.float32) + bo


# ----------------------------------------------------------------------------
# Fused DecoderBlock kernel
# ----------------------------------------------------------------------------
def decoder_block_kernel(
    # activations / masks
    x_ref, key_ref, value_ref, tmask_ref, smask_ref,
    # DecoderBlock.mha + DecoderBlock.norm
    wq_s_ref, wk_s_ref, wv_s_ref, wo_s_ref, bo_s_ref, lnw_ref, lnb_ref,
    # TransformerBlock.mha + norm1
    wq_c_ref, wk_c_ref, wv_c_ref, wo_c_ref, bo_c_ref, ln1w_ref, ln1b_ref,
    # TransformerBlock.ff + norm2
    w1_ref, b1_ref, w2_ref, b2_ref, ln2w_ref, ln2b_ref,
    # output
    out_ref,
    *, heads, lt, ls, emb,
):
    nb = x_ref.shape[0]
    scale = 1.0 / (float(emb) ** 0.5)   # torch scales by sqrt(embedding_dim)

    x = x_ref[...].reshape(nb * lt, emb)          # (rows_tgt, E) f32
    k_in = key_ref[...].reshape(nb * ls, emb)     # (rows_src, E)
    v_in = value_ref[...].reshape(nb * ls, emb)

    # mask -> additive bias, computed once per block (hoisted out of head loops)
    tbias = jnp.where(tmask_ref[...] == 0, jnp.float32(-1e20), jnp.float32(0.0))
    sbias = jnp.where(smask_ref[...] == 0, jnp.float32(-1e20), jnp.float32(0.0))

    # --- DecoderBlock.mha: masked self-attention; residual + norm ---
    # TODO(synk): dropout is identity here (p=0 / eval mode); no RNG drop applied.
    att = _mha(x, x, x, tbias,
               wq_s_ref[...], wk_s_ref[...], wv_s_ref[...],
               wo_s_ref[...], bo_s_ref[...],
               heads=heads, emb=emb, scale=scale)
    query = _layer_norm(att + x, lnw_ref[...], lnb_ref[...])

    # --- TransformerBlock.mha: cross-attention over encoder key/value; res + norm1
    att2 = _mha(query, k_in, v_in, sbias,
                wq_c_ref[...], wk_c_ref[...], wv_c_ref[...],
                wo_c_ref[...], bo_c_ref[...],
                heads=heads, emb=emb, scale=scale)
    y = _layer_norm(att2 + query, ln1w_ref[...], ln1b_ref[...])

    # --- TransformerBlock.ff: Linear -> ReLU -> Linear ---
    h1 = jnp.maximum(
        jnp.dot(y.astype(jnp.bfloat16), w1_ref[...],
                preferred_element_type=jnp.float32) + b1_ref[...], 0.0)
    ff = jnp.dot(h1.astype(jnp.bfloat16), w2_ref[...],
                 preferred_element_type=jnp.float32) + b2_ref[...]

    # --- residual + norm2 ---
    out = _layer_norm(ff + y, ln2w_ref[...], ln2b_ref[...])
    out_ref[...] = out.reshape(nb, lt, emb)


# ----------------------------------------------------------------------------
# Wrapper
# ----------------------------------------------------------------------------
def decoder_block(x, key, value, source_mask, target_mask, params, *, heads,
                  block_n=None, vmem_limit_bytes=None):
    N, Lt, E = x.shape
    Ls = key.shape[1]

    if block_n is None:
        # keep >=2 grid blocks so both v7x TensorCores get work, while still
        # amortizing the ~0.35us per-grid-step overhead with a bigger batch tile.
        block_n = max(1, N // 2)
    while N % block_n:
        block_n -= 1
    grid = (N // block_n,)

    def prep_mask(m, lq, lk):
        m = jnp.asarray(m, jnp.int32)
        if m.ndim == 4:                       # (N, 1, lq, lk) torch-style mask
            m = m.reshape(m.shape[0], m.shape[2], m.shape[3])
        return jnp.broadcast_to(m, (N, lq, lk))

    tmask = prep_mask(target_mask, Lt, Lt)
    smask = prep_mask(source_mask, Lt, Ls)

    def act_spec(a, b):
        return pl.BlockSpec((block_n, a, b), lambda n: (n, 0, 0))

    def full_spec(p):
        return pl.BlockSpec(p.shape, lambda n, _nd=p.ndim: (0,) * _nd)

    in_specs = [
        act_spec(Lt, E),       # x
        act_spec(Ls, E),       # key
        act_spec(Ls, E),       # value
        act_spec(Lt, Lt),      # target mask
        act_spec(Lt, Ls),      # source mask
    ] + [full_spec(p) for p in params]

    kernel = functools.partial(decoder_block_kernel,
                               heads=heads, lt=Lt, ls=Ls, emb=E)

    return pl.pallas_call(
        kernel,
        out_shape=jax.ShapeDtypeStruct((N, Lt, E), jnp.float32),
        grid=grid,
        in_specs=in_specs,
        out_specs=act_spec(Lt, E),
        compiler_params=pltpu.CompilerParams(
            dimension_semantics=("parallel",),
            # raise when enlarging block_n / E / F (v6e scoped default 32 MiB,
            # v7x has only 64 MiB physical VMEM).
            vmem_limit_bytes=vmem_limit_bytes,
        ),
    )(x, key, value, tmask, smask, *params)


# ----------------------------------------------------------------------------
# Parameter init (deterministic, synthetic) in kernel layout:
#   - per-head Dh x Dh Q/K/V weights expanded to block-diagonal (E, E), bf16
#   - fc_out / FFN weights pre-transposed (x @ W.T == x @ WT), bf16
#   - biases / LayerNorm params as (1, dim) f32
# ----------------------------------------------------------------------------
def init_decoder_params(key, E, H, F):
    Dh = E // H
    ks = jax.random.split(key, 14)
    s = 0.02
    bf16 = jnp.bfloat16

    def lin(k, out_dim, in_dim):
        return jax.random.normal(k, (out_dim, in_dim), jnp.float32) * s

    def bias(k, dim):
        return jax.random.normal(k, (dim,), jnp.float32) * s

    def bdiag(wT):   # (Dh, Dh) -> block-diagonal (E, E); same weight for each head
        return jnp.kron(jnp.eye(H, dtype=wT.dtype), wT)

    # DecoderBlock.mha (masked self-attention) + DecoderBlock.norm
    Wq_s, Wk_s, Wv_s = lin(ks[0], Dh, Dh), lin(ks[1], Dh, Dh), lin(ks[2], Dh, Dh)
    Wo_s, bo_s = lin(ks[3], E, E), bias(ks[4], E)
    lnw, lnb = jnp.ones((E,), jnp.float32), jnp.zeros((E,), jnp.float32)
    # TransformerBlock.mha (cross-attention) + norm1
    Wq_c, Wk_c, Wv_c = lin(ks[5], Dh, Dh), lin(ks[6], Dh, Dh), lin(ks[7], Dh, Dh)
    Wo_c, bo_c = lin(ks[8], E, E), bias(ks[9], E)
    ln1w, ln1b = jnp.ones((E,), jnp.float32), jnp.zeros((E,), jnp.float32)
    # TransformerBlock.ff + norm2
    W1, b1 = lin(ks[10], F * E, E), bias(ks[11], F * E)
    W2, b2 = lin(ks[12], E, F * E), bias(ks[13], E)
    ln2w, ln2b = jnp.ones((E,), jnp.float32), jnp.zeros((E,), jnp.float32)

    return [
        bdiag(Wq_s.T).astype(bf16), bdiag(Wk_s.T).astype(bf16),
        bdiag(Wv_s.T).astype(bf16), Wo_s.T.astype(bf16), bo_s.reshape(1, E),
        lnw.reshape(1, E), lnb.reshape(1, E),
        bdiag(Wq_c.T).astype(bf16), bdiag(Wk_c.T).astype(bf16),
        bdiag(Wv_c.T).astype(bf16), Wo_c.T.astype(bf16), bo_c.reshape(1, E),
        ln1w.reshape(1, E), ln1b.reshape(1, E),
        W1.T.astype(bf16), b1.reshape(1, F * E),
        W2.T.astype(bf16), b2.reshape(1, E),
        ln2w.reshape(1, E), ln2b.reshape(1, E),
    ]


if __name__ == "__main__":
    embedding_dim = 32
    heads = 4
    forward_expansion = 4
    N = 2
    tgt_len = 8
    src_len = 8

    root = jax.random.PRNGKey(0)
    kx, kk, kv, kp = jax.random.split(root, 4)

    x = jax.random.normal(kx, (N, tgt_len, embedding_dim), jnp.float32)
    enc_key = jax.random.normal(kk, (N, src_len, embedding_dim), jnp.float32)
    enc_value = jax.random.normal(kv, (N, src_len, embedding_dim), jnp.float32)

    # target mask: causal (N, 1, Lt, Lt); source mask: key padding (N, 1, 1, Ls)
    causal = jnp.tril(jnp.ones((tgt_len, tgt_len), jnp.int32))
    target_mask = jnp.broadcast_to(causal, (N, 1, tgt_len, tgt_len))
    source_mask = jnp.ones((N, 1, 1, src_len), jnp.int32)
    source_mask = source_mask.at[1, 0, 0, src_len - 1].set(0)

    params = init_decoder_params(kp, embedding_dim, heads, forward_expansion)

    fwd = jax.jit(functools.partial(decoder_block, heads=heads))
    out = fwd(x, enc_key, enc_value, source_mask, target_mask, params)
    out = jax.block_until_ready(out)

    assert out.shape == (N, tgt_len, embedding_dim)
    assert bool(jnp.all(jnp.isfinite(out)))
    print("KERNEL_OK")
</pallas_src>

<mosaic_0001>
module attributes {stable_mosaic.version = 11 : i64} {
  func.func @decoder_block_kernel(%arg0: i32, %arg1: memref<1x8x32xf32, #tpu.memory_space<vmem>>, %arg2: memref<1x8x32xf32, #tpu.memory_space<vmem>>, %arg3: memref<1x8x32xf32, #tpu.memory_space<vmem>>, %arg4: memref<1x8x8xi32, #tpu.memory_space<vmem>>, %arg5: memref<1x8x8xi32, #tpu.memory_space<vmem>>, %arg6: memref<32x32xbf16, #tpu.memory_space<vmem>>, %arg7: memref<32x32xbf16, #tpu.memory_space<vmem>>, %arg8: memref<32x32xbf16, #tpu.memory_space<vmem>>, %arg9: memref<32x32xbf16, #tpu.memory_space<vmem>>, %arg10: memref<1x32xf32, #tpu.memory_space<vmem>>, %arg11: memref<1x32xf32, #tpu.memory_space<vmem>>, %arg12: memref<1x32xf32, #tpu.memory_space<vmem>>, %arg13: memref<32x32xbf16, #tpu.memory_space<vmem>>, %arg14: memref<32x32xbf16, #tpu.memory_space<vmem>>, %arg15: memref<32x32xbf16, #tpu.memory_space<vmem>>, %arg16: memref<32x32xbf16, #tpu.memory_space<vmem>>, %arg17: memref<1x32xf32, #tpu.memory_space<vmem>>, %arg18: memref<1x32xf32, #tpu.memory_space<vmem>>, %arg19: memref<1x32xf32, #tpu.memory_space<vmem>>, %arg20: memref<32x128xbf16, #tpu.memory_space<vmem>>, %arg21: memref<1x128xf32, #tpu.memory_space<vmem>>, %arg22: memref<128x32xbf16, #tpu.memory_space<vmem>>, %arg23: memref<1x32xf32, #tpu.memory_space<vmem>>, %arg24: memref<1x32xf32, #tpu.memory_space<vmem>>, %arg25: memref<1x32xf32, #tpu.memory_space<vmem>>, %arg26: memref<1x8x32xf32, #tpu.memory_space<vmem>>) attributes {dimension_semantics = [#tpu.dimension_semantics<parallel>], iteration_bounds = array<i64: 2>, scalar_prefetch = 0 : i64, scratch_operands = 0 : i64, tpu.core_type = #tpu.core_type<tc>, window_params = [{transform_indices = @transform_0, window_bounds = array<i64: 1, 8, 32>}, {transform_indices = @transform_1, window_bounds = array<i64: 1, 8, 32>}, {transform_indices = @transform_2, window_bounds = array<i64: 1, 8, 32>}, {transform_indices = @transform_3, window_bounds = array<i64: 1, 8, 8>}, {transform_indices = @transform_4, window_bounds = array<i64: 1, 8, 8>}, {pipeline_mode = #tpu.pipeline_mode<synchronous>, transform_indices = @transform_5, window_bounds = array<i64: 32, 32>}, {pipeline_mode = #tpu.pipeline_mode<synchronous>, transform_indices = @transform_6, window_bounds = array<i64: 32, 32>}, {pipeline_mode = #tpu.pipeline_mode<synchronous>, transform_indices = @transform_7, window_bounds = array<i64: 32, 32>}, {pipeline_mode = #tpu.pipeline_mode<synchronous>, transform_indices = @transform_8, window_bounds = array<i64: 32, 32>}, {pipeline_mode = #tpu.pipeline_mode<synchronous>, transform_indices = @transform_9, window_bounds = array<i64: 1, 32>}, {pipeline_mode = #tpu.pipeline_mode<synchronous>, transform_indices = @transform_10, window_bounds = array<i64: 1, 32>}, {pipeline_mode = #tpu.pipeline_mode<synchronous>, transform_indices = @transform_11, window_bounds = array<i64: 1, 32>}, {pipeline_mode = #tpu.pipeline_mode<synchronous>, transform_indices = @transform_12, window_bounds = array<i64: 32, 32>}, {pipeline_mode = #tpu.pipeline_mode<synchronous>, transform_indices = @transform_13, window_bounds = array<i64: 32, 32>}, {pipeline_mode = #tpu.pipeline_mode<synchronous>, transform_indices = @transform_14, window_bounds = array<i64: 32, 32>}, {pipeline_mode = #tpu.pipeline_mode<synchronous>, transform_indices = @transform_15, window_bounds = array<i64: 32, 32>}, {pipeline_mode = #tpu.pipeline_mode<synchronous>, transform_indices = @transform_16, window_bounds = array<i64: 1, 32>}, {pipeline_mode = #tpu.pipeline_mode<synchronous>, transform_indices = @transform_17, window_bounds = array<i64: 1, 32>}, {pipeline_mode = #tpu.pipeline_mode<synchronous>, transform_indices = @transform_18, window_bounds = array<i64: 1, 32>}, {pipeline_mode = #tpu.pipeline_mode<synchronous>, transform_indices = @transform_19, window_bounds = array<i64: 32, 128>}, {pipeline_mode = #tpu.pipeline_mode<synchronous>, transform_indices = @transform_20, window_bounds = array<i64: 1, 128>}, {pipeline_mode = #tpu.pipeline_mode<synchronous>, transform_indices = @transform_21, window_bounds = array<i64: 128, 32>}, {pipeline_mode = #tpu.pipeline_mode<synchronous>, transform_indices = @transform_22, window_bounds = array<i64: 1, 32>}, {pipeline_mode = #tpu.pipeline_mode<synchronous>, transform_indices = @transform_23, window_bounds = array<i64: 1, 32>}, {pipeline_mode = #tpu.pipeline_mode<synchronous>, transform_indices = @transform_24, window_bounds = array<i64: 1, 32>}, {transform_indices = @transform_25, window_bounds = array<i64: 1, 8, 32>}]} {
    %c0 = arith.constant 0 : index
    %c0_0 = arith.constant 0 : index
    %c0_1 = arith.constant 0 : index
    %0 = vector.load %arg1[%c0, %c0_0, %c0_1] : memref<1x8x32xf32, #tpu.memory_space<vmem>>, vector<1x8x32xf32>
    %1 = vector.shape_cast %0 : vector<1x8x32xf32> to vector<8x32xf32>
    %c0_2 = arith.constant 0 : index
    %c0_3 = arith.constant 0 : index
    %c0_4 = arith.constant 0 : index
    %2 = vector.load %arg2[%c0_2, %c0_3, %c0_4] : memref<1x8x32xf32, #tpu.memory_space<vmem>>, vector<1x8x32xf32>
    %3 = vector.shape_cast %2 : vector<1x8x32xf32> to vector<8x32xf32>
    %c0_5 = arith.constant 0 : index
    %c0_6 = arith.constant 0 : index
    %c0_7 = arith.constant 0 : index
    %4 = vector.load %arg3[%c0_5, %c0_6, %c0_7] : memref<1x8x32xf32, #tpu.memory_space<vmem>>, vector<1x8x32xf32>
    %5 = vector.shape_cast %4 : vector<1x8x32xf32> to vector<8x32xf32>
    %c0_8 = arith.constant 0 : index
    %c0_9 = arith.constant 0 : index
    %c0_10 = arith.constant 0 : index
    %6 = vector.load %arg4[%c0_8, %c0_9, %c0_10] : memref<1x8x8xi32, #tpu.memory_space<vmem>>, vector<1x8x8xi32>
    %c0_i32 = arith.constant 0 : i32
    %7 = vector.broadcast %c0_i32 : i32 to vector<1x8x8xi32>
    %8 = arith.cmpi eq, %6, %7 : vector<1x8x8xi32>
    %cst = arith.constant -1.000000e+20 : f32
    %cst_11 = arith.constant 0.000000e+00 : f32
    %9 = vector.broadcast %cst : f32 to vector<1x8x8xf32>
    %10 = vector.broadcast %cst_11 : f32 to vector<1x8x8xf32>
    %11 = arith.select %8, %9, %10 : vector<1x8x8xi1>, vector<1x8x8xf32>
    %c0_12 = arith.constant 0 : index
    %c0_13 = arith.constant 0 : index
    %c0_14 = arith.constant 0 : index
    %12 = vector.load %arg5[%c0_12, %c0_13, %c0_14] : memref<1x8x8xi32, #tpu.memory_space<vmem>>, vector<1x8x8xi32>
    %c0_i32_15 = arith.constant 0 : i32
    %13 = vector.broadcast %c0_i32_15 : i32 to vector<1x8x8xi32>
    %14 = arith.cmpi eq, %12, %13 : vector<1x8x8xi32>
    %cst_16 = arith.constant -1.000000e+20 : f32
    %cst_17 = arith.constant 0.000000e+00 : f32
    %15 = vector.broadcast %cst_16 : f32 to vector<1x8x8xf32>
    %16 = vector.broadcast %cst_17 : f32 to vector<1x8x8xf32>
    %17 = arith.select %14, %15, %16 : vector<1x8x8xi1>, vector<1x8x8xf32>
    %c0_18 = arith.constant 0 : index
    %c0_19 = arith.constant 0 : index
    %18 = vector.load %arg6[%c0_18, %c0_19] : memref<32x32xbf16, #tpu.memory_space<vmem>>, vector<32x32xbf16>
    %c0_20 = arith.constant 0 : index
    %c0_21 = arith.constant 0 : index
    %19 = vector.load %arg7[%c0_20, %c0_21] : memref<32x32xbf16, #tpu.memory_space<vmem>>, vector<32x32xbf16>
    %c0_22 = arith.constant 0 : index
    %c0_23 = arith.constant 0 : index
    %20 = vector.load %arg8[%c0_22, %c0_23] : memref<32x32xbf16, #tpu.memory_space<vmem>>, vector<32x32xbf16>
    %c0_24 = arith.constant 0 : index
    %c0_25 = arith.constant 0 : index
    %21 = vector.load %arg9[%c0_24, %c0_25] : memref<32x32xbf16, #tpu.memory_space<vmem>>, vector<32x32xbf16>
    %c0_26 = arith.constant 0 : index
    %c0_27 = arith.constant 0 : index
    %22 = vector.load %arg10[%c0_26, %c0_27] : memref<1x32xf32, #tpu.memory_space<vmem>>, vector<1x32xf32>
    %23 = arith.truncf %1 : vector<8x32xf32> to vector<8x32xbf16>
    %cst_28 = arith.constant dense<0.000000e+00> : vector<8x32xf32>
    %24 = tpu.matmul %23, %18, %cst_28 {dimension_numbers = #tpu.dot_dimension_numbers<[1], [0], [0], [1], [0, 0, 1, 1], [], []>} : vector<8x32xbf16>, vector<32x32xbf16>, vector<8x32xf32> -> vector<8x32xf32>
    %cst_29 = arith.constant 0.176776692 : f32
    %25 = vector.broadcast %cst_29 : f32 to vector<8x32xf32>
    %26 = arith.mulf %24, %25 : vector<8x32xf32>
    %27 = arith.truncf %1 : vector<8x32xf32> to vector<8x32xbf16>
    %cst_30 = arith.constant dense<0.000000e+00> : vector<8x32xf32>
    %28 = tpu.matmul %27, %19, %cst_30 {dimension_numbers = #tpu.dot_dimension_numbers<[1], [0], [0], [1], [0, 0, 1, 1], [], []>} : vector<8x32xbf16>, vector<32x32xbf16>, vector<8x32xf32> -> vector<8x32xf32>
    %29 = arith.truncf %1 : vector<8x32xf32> to vector<8x32xbf16>
    %cst_31 = arith.constant dense<0.000000e+00> : vector<8x32xf32>
    %30 = tpu.matmul %29, %20, %cst_31 {dimension_numbers = #tpu.dot_dimension_numbers<[1], [0], [0], [1], [0, 0, 1, 1], [], []>} : vector<8x32xbf16>, vector<32x32xbf16>, vector<8x32xf32> -> vector<8x32xf32>
    %31 = vector.extract_strided_slice %26 {offsets = [0, 0], sizes = [8, 8], strides = [1, 1]} : vector<8x32xf32> to vector<8x8xf32>
    %32 = vector.shape_cast %31 : vector<8x8xf32> to vector<1x8x8xf32>
    %33 = arith.truncf %32 : vector<1x8x8xf32> to vector<1x8x8xbf16>
    %34 = vector.extract_strided_slice %28 {offsets = [0, 0], sizes = [8, 8], strides = [1, 1]} : vector<8x32xf32> to vector<8x8xf32>
    %35 = vector.shape_cast %34 : vector<8x8xf32> to vector<1x8x8xf32>
    %36 = arith.truncf %35 : vector<1x8x8xf32> to vector<1x8x8xbf16>
    %37 = vector.extract_strided_slice %30 {offsets = [0, 0], sizes = [8, 8], strides = [1, 1]} : vector<8x32xf32> to vector<8x8xf32>
    %38 = vector.shape_cast %37 : vector<8x8xf32> to vector<1x8x8xf32>
    %39 = arith.truncf %38 : vector<1x8x8xf32> to vector<1x8x8xbf16>
    "tpu.trace_start"() <{level = 10 : i32, message = "bqd,bkd->bqk"}> : () -> ()
    %cst_32 = arith.constant dense<0.000000e+00> : vector<1x8x8xf32>
    %40 = tpu.matmul %33, %36, %cst_32 {dimension_numbers = #tpu.dot_dimension_numbers<[2], [2], [1], [1], [0, 0, 0, 1, 1, 1], [0], [0]>} : vector<1x8x8xbf16>, vector<1x8x8xbf16>, vector<1x8x8xf32> -> vector<1x8x8xf32>
    "tpu.trace_stop"() : () -> ()
    %41 = arith.addf %40, %11 : vector<1x8x8xf32>
    %cst_33 = arith.constant dense<0xFF800000> : vector<1x8xf32>
    %42 = vector.multi_reduction <maximumf>, %41, %cst_33 [2] : vector<1x8x8xf32> to vector<1x8xf32>
    %43 = vector.shape_cast %42 : vector<1x8xf32> to vector<1x8x1xf32>
    %44 = vector.broadcast %43 : vector<1x8x1xf32> to vector<1x8x8xf32>
    %45 = arith.subf %41, %44 : vector<1x8x8xf32>
    %46 = math.exp %45 : vector<1x8x8xf32>
    %cst_34 = arith.constant dense<0.000000e+00> : vector<1x8xf32>
    %47 = vector.multi_reduction <add>, %46, %cst_34 [2] : vector<1x8x8xf32> to vector<1x8xf32>
    %48 = vector.shape_cast %47 : vector<1x8xf32> to vector<1x8x1xf32>
    %49 = tpu.reciprocal %48 {approx = true} : vector<1x8x1xf32> -> vector<1x8x1xf32>
    %50 = vector.broadcast %49 : vector<1x8x1xf32> to vector<1x8x8xf32>
    %51 = arith.mulf %46, %50 : vector<1x8x8xf32>
    %52 = arith.truncf %51 : vector<1x8x8xf32> to vector<1x8x8xbf16>
    "tpu.trace_start"() <{level = 10 : i32, message = "bqk,bkd->bqd"}> : () -> ()
    %cst_35 = arith.constant dense<0.000000e+00> : vector<1x8x8xf32>
    %53 = tpu.matmul %52, %39, %cst_35 {dimension_numbers = #tpu.dot_dimension_numbers<[2], [1], [1], [2], [0, 0, 0, 1, 1, 2], [0], [0]>} : vector<1x8x8xbf16>, vector<1x8x8xbf16>, vector<1x8x8xf32> -> vector<1x8x8xf32>
    "tpu.trace_stop"() : () -> ()
    %54 = vector.extract_strided_slice %26 {offsets = [0, 8], sizes = [8, 8], strides = [1, 1]} : vector<8x32xf32> to vector<8x8xf32>
    %55 = vector.shape_cast %54 : vector<8x8xf32> to vector<1x8x8xf32>
    %56 = arith.truncf %55 : vector<1x8x8xf32> to vector<1x8x8xbf16>
    %57 = vector.extract_strided_slice %28 {offsets = [0, 8], sizes = [8, 8], strides = [1, 1]} : vector<8x32xf32> to vector<8x8xf32>
    %58 = vector.shape_cast %57 : vector<8x8xf32> to vector<1x8x8xf32>
    %59 = arith.truncf %58 : vector<1x8x8xf32> to vector<1x8x8xbf16>
    %60 = vector.extract_strided_slice %30 {offsets = [0, 8], sizes = [8, 8], strides = [1, 1]} : vector<8x32xf32> to vector<8x8xf32>
    %61 = vector.shape_cast %60 : vector<8x8xf32> to vector<1x8x8xf32>
    %62 = arith.truncf %61 : vector<1x8x8xf32> to vector<1x8x8xbf16>
    "tpu.trace_start"() <{level = 10 : i32, message = "bqd,bkd->bqk"}> : () -> ()
    %cst_36 = arith.constant dense<0.000000e+00> : vector<1x8x8xf32>
    %63 = tpu.matmul %56, %59, %cst_36 {dimension_numbers = #tpu.dot_dimension_numbers<[2], [2], [1], [1], [0, 0, 0, 1, 1, 1], [0], [0]>} : vector<1x8x8xbf16>, vector<1x8x8xbf16>, vector<1x8x8xf32> -> vector<1x8x8xf32>
    "tpu.trace_stop"() : () -> ()
    %64 = arith.addf %63, %11 : vector<1x8x8xf32>
    %cst_37 = arith.constant dense<0xFF800000> : vector<1x8xf32>
    %65 = vector.multi_reduction <maximumf>, %64, %cst_37 [2] : vector<1x8x8xf32> to vector<1x8xf32>
    %66 = vector.shape_cast %65 : vector<1x8xf32> to vector<1x8x1xf32>
    %67 = vector.broadcast %66 : vector<1x8x1xf32> to vector<1x8x8xf32>
    %68 = arith.subf %64, %67 : vector<1x8x8xf32>
    %69 = math.exp %68 : vector<1x8x8xf32>
    %cst_38 = arith.constant dense<0.000000e+00> : vector<1x8xf32>
    %70 = vector.multi_reduction <add>, %69, %cst_38 [2] : vector<1x8x8xf32> to vector<1x8xf32>
    %71 = vector.shape_cast %70 : vector<1x8xf32> to vector<1x8x1xf32>
    %72 = tpu.reciprocal %71 {approx = true} : vector<1x8x1xf32> -> vector<1x8x1xf32>
    %73 = vector.broadcast %72 : vector<1x8x1xf32> to vector<1x8x8xf32>
    %74 = arith.mulf %69, %73 : vector<1x8x8xf32>
    %75 = arith.truncf %74 : vector<1x8x8xf32> to vector<1x8x8xbf16>
    "tpu.trace_start"() <{level = 10 : i32, message = "bqk,bkd->bqd"}> : () -> ()
    %cst_39 = arith.constant dense<0.000000e+00> : vector<1x8x8xf32>
    %76 = tpu.matmul %75, %62, %cst_39 {dimension_numbers = #tpu.dot_dimension_numbers<[2], [1], [1], [2], [0, 0, 0, 1, 1, 2], [0], [0]>} : vector<1x8x8xbf16>, vector<1x8x8xbf16>, vector<1x8x8xf32> -> vector<1x8x8xf32>
    "tpu.trace_stop"() : () -> ()
    %77 = vector.extract_strided_slice %26 {offsets = [0, 16], sizes = [8, 8], strides = [1, 1]} : vector<8x32xf32> to vector<8x8xf32>
    %78 = vector.shape_cast %77 : vector<8x8xf32> to vector<1x8x8xf32>
    %79 = arith.truncf %78 : vector<1x8x8xf32> to vector<1x8x8xbf16>
    %80 = vector.extract_strided_slice %28 {offsets = [0, 16], sizes = [8, 8], strides = [1, 1]} : vector<8x32xf32> to vector<8x8xf32>
    %81 = vector.shape_cast %80 : vector<8x8xf32> to vector<1x8x8xf32>
    %82 = arith.truncf %81 : vector<1x8x8xf32> to vector<1x8x8xbf16>
    %83 = vector.extract_strided_slice %30 {offsets = [0, 16], sizes = [8, 8], strides = [1, 1]} : vector<8x32xf32> to vector<8x8xf32>
    %84 = vector.shape_cast %83 : vector<8x8xf32> to vector<1x8x8xf32>
    %85 = arith.truncf %84 : vector<1x8x8xf32> to vector<1x8x8xbf16>
    "tpu.trace_start"() <{level = 10 : i32, message = "bqd,bkd->bqk"}> : () -> ()
    %cst_40 = arith.constant dense<0.000000e+00> : vector<1x8x8xf32>
    %86 = tpu.matmul %79, %82, %cst_40 {dimension_numbers = #tpu.dot_dimension_numbers<[2], [2], [1], [1], [0, 0, 0, 1, 1, 1], [0], [0]>} : vector<1x8x8xbf16>, vector<1x8x8xbf16>, vector<1x8x8xf32> -> vector<1x8x8xf32>
    "tpu.trace_stop"() : () -> ()
    %87 = arith.addf %86, %11 : vector<1x8x8xf32>
    %cst_41 = arith.constant dense<0xFF800000> : vector<1x8xf32>
    %88 = vector.multi_reduction <maximumf>, %87, %cst_41 [2] : vector<1x8x8xf32> to vector<1x8xf32>
    %89 = vector.shape_cast %88 : vector<1x8xf32> to vector<1x8x1xf32>
    %90 = vector.broadcast %89 : vector<1x8x1xf32> to vector<1x8x8xf32>
    %91 = arith.subf %87, %90 : vector<1x8x8xf32>
    %92 = math.exp %91 : vector<1x8x8xf32>
    %cst_42 = arith.constant dense<0.000000e+00> : vector<1x8xf32>
    %93 = vector.multi_reduction <add>, %92, %cst_42 [2] : vector<1x8x8xf32> to vector<1x8xf32>
    %94 = vector.shape_cast %93 : vector<1x8xf32> to vector<1x8x1xf32>
    %95 = tpu.reciprocal %94 {approx = true} : vector<1x8x1xf32> -> vector<1x8x1xf32>
    %96 = vector.broadcast %95 : vector<1x8x1xf32> to vector<1x8x8xf32>
    %97 = arith.mulf %92, %96 : vector<1x8x8xf32>
    %98 = arith.truncf %97 : vector<1x8x8xf32> to vector<1x8x8xbf16>
    "tpu.trace_start"() <{level = 10 : i32, message = "bqk,bkd->bqd"}> : () -> ()
    %cst_43 = arith.constant dense<0.000000e+00> : vector<1x8x8xf32>
    %99 = tpu.matmul %98, %85, %cst_43 {dimension_numbers = #tpu.dot_dimension_numbers<[2], [1], [1], [2], [0, 0, 0, 1, 1, 2], [0], [0]>} : vector<1x8x8xbf16>, vector<1x8x8xbf16>, vector<1x8x8xf32> -> vector<1x8x8xf32>
    "tpu.trace_stop"() : () -> ()
    %100 = vector.extract_strided_slice %26 {offsets = [0, 24], sizes = [8, 8], strides = [1, 1]} : vector<8x32xf32> to vector<8x8xf32>
    %101 = vector.shape_cast %100 : vector<8x8xf32> to vector<1x8x8xf32>
    %102 = arith.truncf %101 : vector<1x8x8xf32> to vector<1x8x8xbf16>
    %103 = vector.extract_strided_slice %28 {offsets = [0, 24], sizes = [8, 8], strides = [1, 1]} : vector<8x32xf32> to vector<8x8xf32>
    %104 = vector.shape_cast %103 : vector<8x8xf32> to vector<1x8x8xf32>
    %105 = arith.truncf %104 : vector<1x8x8xf32> to vector<1x8x8xbf16>
    %106 = vector.extract_strided_slice %30 {offsets = [0, 24], sizes = [8, 8], strides = [1, 1]} : vector<8x32xf32> to vector<8x8xf32>
    %107 = vector.shape_cast %106 : vector<8x8xf32> to vector<1x8x8xf32>
    %108 = arith.truncf %107 : vector<1x8x8xf32> to vector<1x8x8xbf16>
    "tpu.trace_start"() <{level = 10 : i32, message = "bqd,bkd->bqk"}> : () -> ()
    %cst_44 = arith.constant dense<0.000000e+00> : vector<1x8x8xf32>
    %109 = tpu.matmul %102, %105, %cst_44 {dimension_numbers = #tpu.dot_dimension_numbers<[2], [2], [1], [1], [0, 0, 0, 1, 1, 1], [0], [0]>} : vector<1x8x8xbf16>, vector<1x8x8xbf16>, vector<1x8x8xf32> -> vector<1x8x8xf32>
    "tpu.trace_stop"() : () -> ()
    %110 = arith.addf %109, %11 : vector<1x8x8xf32>
    %cst_45 = arith.constant dense<0xFF800000> : vector<1x8xf32>
    %111 = vector.multi_reduction <maximumf>, %110, %cst_45 [2] : vector<1x8x8xf32> to vector<1x8xf32>
    %112 = vector.shape_cast %111 : vector<1x8xf32> to vector<1x8x1xf32>
    %113 = vector.broadcast %112 : vector<1x8x1xf32> to vector<1x8x8xf32>
    %114 = arith.subf %110, %113 : vector<1x8x8xf32>
    %115 = math.exp %114 : vector<1x8x8xf32>
    %cst_46 = arith.constant dense<0.000000e+00> : vector<1x8xf32>
    %116 = vector.multi_reduction <add>, %115, %cst_46 [2] : vector<1x8x8xf32> to vector<1x8xf32>
    %117 = vector.shape_cast %116 : vector<1x8xf32> to vector<1x8x1xf32>
    %118 = tpu.reciprocal %117 {approx = true} : vector<1x8x1xf32> -> vector<1x8x1xf32>
    %119 = vector.broadcast %118 : vector<1x8x1xf32> to vector<1x8x8xf32>
    %120 = arith.mulf %115, %119 : vector<1x8x8xf32>
    %121 = arith.truncf %120 : vector<1x8x8xf32> to vector<1x8x8xbf16>
    "tpu.trace_start"() <{level = 10 : i32, message = "bqk,bkd->bqd"}> : () -> ()
    %cst_47 = arith.constant dense<0.000000e+00> : vector<1x8x8xf32>
    %122 = tpu.matmul %121, %108, %cst_47 {dimension_numbers = #tpu.dot_dimension_numbers<[2], [1], [1], [2], [0, 0, 0, 1, 1, 2], [0], [0]>} : vector<1x8x8xbf16>, vector<1x8x8xbf16>, vector<1x8x8xf32> -> vector<1x8x8xf32>
    "tpu.trace_stop"() : () -> ()
    %123 = tpu.concatenate %53, %76, %99, %122 in 2 : vector<1x8x8xf32>, vector<1x8x8xf32>, vector<1x8x8xf32>, vector<1x8x8xf32> -> vector<1x8x32xf32>
    %124 = vector.shape_cast %123 : vector<1x8x32xf32> to vector<8x32xf32>
    %125 = arith.truncf %124 : vector<8x32xf32> to vector<8x32xbf16>
    %cst_48 = arith.constant dense<0.000000e+00> : vector<8x32xf32>
    %126 = tpu.matmul %125, %21, %cst_48 {dimension_numbers = #tpu.dot_dimension_numbers<[1], [0], [0], [1], [0, 0, 1, 1], [], []>} : vector<8x32xbf16>, vector<32x32xbf16>, vector<8x32xf32> -> vector<8x32xf32>
    %127 = vector.broadcast %22 : vector<1x32xf32> to vector<8x32xf32>
    %128 = arith.addf %126, %127 : vector<8x32xf32>
    %129 = arith.addf %128, %1 : vector<8x32xf32>
    %c0_49 = arith.constant 0 : index
    %c0_50 = arith.constant 0 : index
    %130 = vector.load %arg11[%c0_49, %c0_50] : memref<1x32xf32, #tpu.memory_space<vmem>>, vector<1x32xf32>
    %c0_51 = arith.constant 0 : index
    %c0_52 = arith.constant 0 : index
    %131 = vector.load %arg12[%c0_51, %c0_52] : memref<1x32xf32, #tpu.memory_space<vmem>>, vector<1x32xf32>
    %cst_53 = arith.constant dense<0.000000e+00> : vector<8xf32>
    %132 = vector.multi_reduction <add>, %129, %cst_53 [1] : vector<8x32xf32> to vector<8xf32>
    %133 = vector.shape_cast %132 : vector<8xf32> to vector<8x1xf32>
    %cst_54 = arith.constant 3.200000e+01 : f32
    %134 = vector.broadcast %cst_54 : f32 to vector<8x1xf32>
    %135 = arith.divf %133, %134 : vector<8x1xf32>
    %136 = vector.broadcast %135 : vector<8x1xf32> to vector<8x32xf32>
    %137 = arith.subf %129, %136 : vector<8x32xf32>
    %138 = arith.mulf %137, %137 : vector<8x32xf32>
    %cst_55 = arith.constant dense<0.000000e+00> : vector<8xf32>
    %139 = vector.multi_reduction <add>, %138, %cst_55 [1] : vector<8x32xf32> to vector<8xf32>
    %140 = vector.shape_cast %139 : vector<8xf32> to vector<8x1xf32>
    %cst_56 = arith.constant 3.200000e+01 : f32
    %141 = vector.broadcast %cst_56 : f32 to vector<8x1xf32>
    %142 = arith.divf %140, %141 : vector<8x1xf32>
    %cst_57 = arith.constant 9.99999974E-6 : f32
    %143 = vector.broadcast %cst_57 : f32 to vector<8x1xf32>
    %144 = arith.addf %142, %143 : vector<8x1xf32>
    %145 = math.rsqrt %144 : vector<8x1xf32>
    %146 = vector.broadcast %145 : vector<8x1xf32> to vector<8x32xf32>
    %147 = arith.mulf %137, %146 : vector<8x32xf32>
    %148 = vector.broadcast %130 : vector<1x32xf32> to vector<8x32xf32>
    %149 = arith.mulf %147, %148 : vector<8x32xf32>
    %150 = vector.broadcast %131 : vector<1x32xf32> to vector<8x32xf32>
    %151 = arith.addf %149, %150 : vector<8x32xf32>
    %c0_58 = arith.constant 0 : index
    %c0_59 = arith.constant 0 : index
    %152 = vector.load %arg13[%c0_58, %c0_59] : memref<32x32xbf16, #tpu.memory_space<vmem>>, vector<32x32xbf16>
    %c0_60 = arith.constant 0 : index
    %c0_61 = arith.constant 0 : index
    %153 = vector.load %arg14[%c0_60, %c0_61] : memref<32x32xbf16, #tpu.memory_space<vmem>>, vector<32x32xbf16>
    %c0_62 = arith.constant 0 : index
    %c0_63 = arith.constant 0 : index
    %154 = vector.load %arg15[%c0_62, %c0_63] : memref<32x32xbf16, #tpu.memory_space<vmem>>, vector<32x32xbf16>
    %c0_64 = arith.constant 0 : index
    %c0_65 = arith.constant 0 : index
    %155 = vector.load %arg16[%c0_64, %c0_65] : memref<32x32xbf16, #tpu.memory_space<vmem>>, vector<32x32xbf16>
    %c0_66 = arith.constant 0 : index
    %c0_67 = arith.constant 0 : index
    %156 = vector.load %arg17[%c0_66, %c0_67] : memref<1x32xf32, #tpu.memory_space<vmem>>, vector<1x32xf32>
    %157 = arith.truncf %151 : vector<8x32xf32> to vector<8x32xbf16>
    %cst_68 = arith.constant dense<0.000000e+00> : vector<8x32xf32>
    %158 = tpu.matmul %157, %152, %cst_68 {dimension_numbers = #tpu.dot_dimension_numbers<[1], [0], [0], [1], [0, 0, 1, 1], [], []>} : vector<8x32xbf16>, vector<32x32xbf16>, vector<8x32xf32> -> vector<8x32xf32>
    %cst_69 = arith.constant 0.176776692 : f32
    %159 = vector.broadcast %cst_69 : f32 to vector<8x32xf32>
    %160 = arith.mulf %158, %159 : vector<8x32xf32>
    %161 = arith.truncf %3 : vector<8x32xf32> to vector<8x32xbf16>
    %cst_70 = arith.constant dense<0.000000e+00> : vector<8x32xf32>
    %162 = tpu.matmul %161, %153, %cst_70 {dimension_numbers = #tpu.dot_dimension_numbers<[1], [0], [0], [1], [0, 0, 1, 1], [], []>} : vector<8x32xbf16>, vector<32x32xbf16>, vector<8x32xf32> -> vector<8x32xf32>
    %163 = arith.truncf %5 : vector<8x32xf32> to vector<8x32xbf16>
    %cst_71 = arith.constant dense<0.000000e+00> : vector<8x32xf32>
    %164 = tpu.matmul %163, %154, %cst_71 {dimension_numbers = #tpu.dot_dimension_numbers<[1], [0], [0], [1], [0, 0, 1, 1], [], []>} : vector<8x32xbf16>, vector<32x32xbf16>, vector<8x32xf32> -> vector<8x32xf32>
    %165 = vector.extract_strided_slice %160 {offsets = [0, 0], sizes = [8, 8], strides = [1, 1]} : vector<8x32xf32> to vector<8x8xf32>
    %166 = vector.shape_cast %165 : vector<8x8xf32> to vector<1x8x8xf32>
    %167 = arith.truncf %166 : vector<1x8x8xf32> to vector<1x8x8xbf16>
    %168 = vector.extract_strided_slice %162 {offsets = [0, 0], sizes = [8, 8], strides = [1, 1]} : vector<8x32xf32> to vector<8x8xf32>
    %169 = vector.shape_cast %168 : vector<8x8xf32> to vector<1x8x8xf32>
    %170 = arith.truncf %169 : vector<1x8x8xf32> to vector<1x8x8xbf16>
    %171 = vector.extract_strided_slice %164 {offsets = [0, 0], sizes = [8, 8], strides = [1, 1]} : vector<8x32xf32> to vector<8x8xf32>
    %172 = vector.shape_cast %171 : vector<8x8xf32> to vector<1x8x8xf32>
    %173 = arith.truncf %172 : vector<1x8x8xf32> to vector<1x8x8xbf16>
    "tpu.trace_start"() <{level = 10 : i32, message = "bqd,bkd->bqk"}> : () -> ()
    %cst_72 = arith.constant dense<0.000000e+00> : vector<1x8x8xf32>
    %174 = tpu.matmul %167, %170, %cst_72 {dimension_numbers = #tpu.dot_dimension_numbers<[2], [2], [1], [1], [0, 0, 0, 1, 1, 1], [0], [0]>} : vector<1x8x8xbf16>, vector<1x8x8xbf16>, vector<1x8x8xf32> -> vector<1x8x8xf32>
    "tpu.trace_stop"() : () -> ()
    %175 = arith.addf %174, %17 : vector<1x8x8xf32>
    %cst_73 = arith.constant dense<0xFF800000> : vector<1x8xf32>
    %176 = vector.multi_reduction <maximumf>, %175, %cst_73 [2] : vector<1x8x8xf32> to vector<1x8xf32>
    %177 = vector.shape_cast %176 : vector<1x8xf32> to vector<1x8x1xf32>
    %178 = vector.broadcast %177 : vector<1x8x1xf32> to vector<1x8x8xf32>
    %179 = arith.subf %175, %178 : vector<1x8x8xf32>
    %180 = math.exp %179 : vector<1x8x8xf32>
    %cst_74 = arith.constant dense<0.000000e+00> : vector<1x8xf32>
    %181 = vector.multi_reduction <add>, %180, %cst_74 [2] : vector<1x8x8xf32> to vector<1x8xf32>
    %182 = vector.shape_cast %181 : vector<1x8xf32> to vector<1x8x1xf32>
    %183 = tpu.reciprocal %182 {approx = true} : vector<1x8x1xf32> -> vector<1x8x1xf32>
    %184 = vector.broadcast %183 : vector<1x8x1xf32> to vector<1x8x8xf32>
    %185 = arith.mulf %180, %184 : vector<1x8x8xf32>
    %186 = arith.truncf %185 : vector<1x8x8xf32> to vector<1x8x8xbf16>
    "tpu.trace_start"() <{level = 10 : i32, message = "bqk,bkd->bqd"}> : () -> ()
    %cst_75 = arith.constant dense<0.000000e+00> : vector<1x8x8xf32>
    %187 = tpu.matmul %186, %173, %cst_75 {dimension_numbers = #tpu.dot_dimension_numbers<[2], [1], [1], [2], [0, 0, 0, 1, 1, 2], [0], [0]>} : vector<1x8x8xbf16>, vector<1x8x8xbf16>, vector<1x8x8xf32> -> vector<1x8x8xf32>
    "tpu.trace_stop"() : () -> ()
    %188 = vector.extract_strided_slice %160 {offsets = [0, 8], sizes = [8, 8], strides = [1, 1]} : vector<8x32xf32> to vector<8x8xf32>
    %189 = vector.shape_cast %188 : vector<8x8xf32> to vector<1x8x8xf32>
    %190 = arith.truncf %189 : vector<1x8x8xf32> to vector<1x8x8xbf16>
    %191 = vector.extract_strided_slice %162 {offsets = [0, 8], sizes = [8, 8], strides = [1, 1]} : vector<8x32xf32> to vector<8x8xf32>
    %192 = vector.shape_cast %191 : vector<8x8xf32> to vector<1x8x8xf32>
    %193 = arith.truncf %192 : vector<1x8x8xf32> to vector<1x8x8xbf16>
    %194 = vector.extract_strided_slice %164 {offsets = [0, 8], sizes = [8, 8], strides = [1, 1]} : vector<8x32xf32> to vector<8x8xf32>
    %195 = vector.shape_cast %194 : vector<8x8xf32> to vector<1x8x8xf32>
    %196 = arith.truncf %195 : vector<1x8x8xf32> to vector<1x8x8xbf16>
    "tpu.trace_start"() <{level = 10 : i32, message = "bqd,bkd->bqk"}> : () -> ()
    %cst_76 = arith.constant dense<0.000000e+00> : vector<1x8x8xf32>
    %197 = tpu.matmul %190, %193, %cst_76 {dimension_numbers = #tpu.dot_dimension_numbers<[2], [2], [1], [1], [0, 0, 0, 1, 1, 1], [0], [0]>} : vector<1x8x8xbf16>, vector<1x8x8xbf16>, vector<1x8x8xf32> -> vector<1x8x8xf32>
    "tpu.trace_stop"() : () -> ()
    %198 = arith.addf %197, %17 : vector<1x8x8xf32>
    %cst_77 = arith.constant dense<0xFF800000> : vector<1x8xf32>
    %199 = vector.multi_reduction <maximumf>, %198, %cst_77 [2] : vector<1x8x8xf32> to vector<1x8xf32>
    %200 = vector.shape_cast %199 : vector<1x8xf32> to vector<1x8x1xf32>
    %201 = vector.broadcast %200 : vector<1x8x1xf32> to vector<1x8x8xf32>
    %202 = arith.subf %198, %201 : vector<1x8x8xf32>
    %203 = math.exp %202 : vector<1x8x8xf32>
    %cst_78 = arith.constant dense<0.000000e+00> : vector<1x8xf32>
    %204 = vector.multi_reduction <add>, %203, %cst_78 [2] : vector<1x8x8xf32> to vector<1x8xf32>
    %205 = vector.shape_cast %204 : vector<1x8xf32> to vector<1x8x1xf32>
    %206 = tpu.reciprocal %205 {approx = true} : vector<1x8x1xf32> -> vector<1x8x1xf32>
    %207 = vector.broadcast %206 : vector<1x8x1xf32> to vector<1x8x8xf32>
    %208 = arith.mulf %203, %207 : vector<1x8x8xf32>
    %209 = arith.truncf %208 : vector<1x8x8xf32> to vector<1x8x8xbf16>
    "tpu.trace_start"() <{level = 10 : i32, message = "bqk,bkd->bqd"}> : () -> ()
    %cst_79 = arith.constant dense<0.000000e+00> : vector<1x8x8xf32>
    %210 = tpu.matmul %209, %196, %cst_79 {dimension_numbers = #tpu.dot_dimension_numbers<[2], [1], [1], [2], [0, 0, 0, 1, 1, 2], [0], [0]>} : vector<1x8x8xbf16>, vector<1x8x8xbf16>, vector<1x8x8xf32> -> vector<1x8x8xf32>
    "tpu.trace_stop"() : () -> ()
    %211 = vector.extract_strided_slice %160 {offsets = [0, 16], sizes = [8, 8], strides = [1, 1]} : vector<8x32xf32> to vector<8x8xf32>
    %212 = vector.shape_cast %211 : vector<8x8xf32> to vector<1x8x8xf32>
    %213 = arith.truncf %212 : vector<1x8x8xf32> to vector<1x8x8xbf16>
    %214 = vector.extract_strided_slice %162 {offsets = [0, 16], sizes = [8, 8], strides = [1, 1]} : vector<8x32xf32> to vector<8x8xf32>
    %215 = vector.shape_cast %214 : vector<8x8xf32> to vector<1x8x8xf32>
    %216 = arith.truncf %215 : vector<1x8x8xf32> to vector<1x8x8xbf16>
    %217 = vector.extract_strided_slice %164 {offsets = [0, 16], sizes = [8, 8], strides = [1, 1]} : vector<8x32xf32> to vector<8x8xf32>
    %218 = vector.shape_cast %217 : vector<8x8xf32> to vector<1x8x8xf32>
    %219 = arith.truncf %218 : vector<1x8x8xf32> to vector<1x8x8xbf16>
    "tpu.trace_start"() <{level = 10 : i32, message = "bqd,bkd->bqk"}> : () -> ()
    %cst_80 = arith.constant dense<0.000000e+00> : vector<1x8x8xf32>
    %220 = tpu.matmul %213, %216, %cst_80 {dimension_numbers = #tpu.dot_dimension_numbers<[2], [2], [1], [1], [0, 0, 0, 1, 1, 1], [0], [0]>} : vector<1x8x8xbf16>, vector<1x8x8xbf16>, vector<1x8x8xf32> -> vector<1x8x8xf32>
    "tpu.trace_stop"() : () -> ()
    %221 = arith.addf %220, %17 : vector<1x8x8xf32>
    %cst_81 = arith.constant dense<0xFF800000> : vector<1x8xf32>
    %222 = vector.multi_reduction <maximumf>, %221, %cst_81 [2] : vector<1x8x8xf32> to vector<1x8xf32>
    %223 = vector.shape_cast %222 : vector<1x8xf32> to vector<1x8x1xf32>
    %224 = vector.broadcast %223 : vector<1x8x1xf32> to vector<1x8x8xf32>
    %225 = arith.subf %221, %224 : vector<1x8x8xf32>
    %226 = math.exp %225 : vector<1x8x8xf32>
    %cst_82 = arith.constant dense<0.000000e+00> : vector<1x8xf32>
    %227 = vector.multi_reduction <add>, %226, %cst_82 [2] : vector<1x8x8xf32> to vector<1x8xf32>
    %228 = vector.shape_cast %227 : vector<1x8xf32> to vector<1x8x1xf32>
    %229 = tpu.reciprocal %228 {approx = true} : vector<1x8x1xf32> -> vector<1x8x1xf32>
    %230 = vector.broadcast %229 : vector<1x8x1xf32> to vector<1x8x8xf32>
    %231 = arith.mulf %226, %230 : vector<1x8x8xf32>
    %232 = arith.truncf %231 : vector<1x8x8xf32> to vector<1x8x8xbf16>
    "tpu.trace_start"() <{level = 10 : i32, message = "bqk,bkd->bqd"}> : () -> ()
    %cst_83 = arith.constant dense<0.000000e+00> : vector<1x8x8xf32>
    %233 = tpu.matmul %232, %219, %cst_83 {dimension_numbers = #tpu.dot_dimension_numbers<[2], [1], [1], [2], [0, 0, 0, 1, 1, 2], [0], [0]>} : vector<1x8x8xbf16>, vector<1x8x8xbf16>, vector<1x8x8xf32> -> vector<1x8x8xf32>
    "tpu.trace_stop"() : () -> ()
    %234 = vector.extract_strided_slice %160 {offsets = [0, 24], sizes = [8, 8], strides = [1, 1]} : vector<8x32xf32> to vector<8x8xf32>
    %235 = vector.shape_cast %234 : vector<8x8xf32> to vector<1x8x8xf32>
    %236 = arith.truncf %235 : vector<1x8x8xf32> to vector<1x8x8xbf16>
    %237 = vector.extract_strided_slice %162 {offsets = [0, 24], sizes = [8, 8], strides = [1, 1]} : vector<8x32xf32> to vector<8x8xf32>
    %238 = vector.shape_cast %237 : vector<8x8xf32> to vector<1x8x8xf32>
    %239 = arith.truncf %238 : vector<1x8x8xf32> to vector<1x8x8xbf16>
    %240 = vector.extract_strided_slice %164 {offsets = [0, 24], sizes = [8, 8], strides = [1, 1]} : vector<8x32xf32> to vector<8x8xf32>
    %241 = vector.shape_cast %240 : vector<8x8xf32> to vector<1x8x8xf32>
    %242 = arith.truncf %241 : vector<1x8x8xf32> to vector<1x8x8xbf16>
    "tpu.trace_start"() <{level = 10 : i32, message = "bqd,bkd->bqk"}> : () -> ()
    %cst_84 = arith.constant dense<0.000000e+00> : vector<1x8x8xf32>
    %243 = tpu.matmul %236, %239, %cst_84 {dimension_numbers = #tpu.dot_dimension_numbers<[2], [2], [1], [1], [0, 0, 0, 1, 1, 1], [0], [0]>} : vector<1x8x8xbf16>, vector<1x8x8xbf16>, vector<1x8x8xf32> -> vector<1x8x8xf32>
    "tpu.trace_stop"() : () -> ()
    %244 = arith.addf %243, %17 : vector<1x8x8xf32>
    %cst_85 = arith.constant dense<0xFF800000> : vector<1x8xf32>
    %245 = vector.multi_reduction <maximumf>, %244, %cst_85 [2] : vector<1x8x8xf32> to vector<1x8xf32>
    %246 = vector.shape_cast %245 : vector<1x8xf32> to vector<1x8x1xf32>
    %247 = vector.broadcast %246 : vector<1x8x1xf32> to vector<1x8x8xf32>
    %248 = arith.subf %244, %247 : vector<1x8x8xf32>
    %249 = math.exp %248 : vector<1x8x8xf32>
    %cst_86 = arith.constant dense<0.000000e+00> : vector<1x8xf32>
    %250 = vector.multi_reduction <add>, %249, %cst_86 [2] : vector<1x8x8xf32> to vector<1x8xf32>
    %251 = vector.shape_cast %250 : vector<1x8xf32> to vector<1x8x1xf32>
    %252 = tpu.reciprocal %251 {approx = true} : vector<1x8x1xf32> -> vector<1x8x1xf32>
    %253 = vector.broadcast %252 : vector<1x8x1xf32> to vector<1x8x8xf32>
    %254 = arith.mulf %249, %253 : vector<1x8x8xf32>
    %255 = arith.truncf %254 : vector<1x8x8xf32> to vector<1x8x8xbf16>
    "tpu.trace_start"() <{level = 10 : i32, message = "bqk,bkd->bqd"}> : () -> ()
    %cst_87 = arith.constant dense<0.000000e+00> : vector<1x8x8xf32>
    %256 = tpu.matmul %255, %242, %cst_87 {dimension_numbers = #tpu.dot_dimension_numbers<[2], [1], [1], [2], [0, 0, 0, 1, 1, 2], [0], [0]>} : vector<1x8x8xbf16>, vector<1x8x8xbf16>, vector<1x8x8xf32> -> vector<1x8x8xf32>
    "tpu.trace_stop"() : () -> ()
    %257 = tpu.concatenate %187, %210, %233, %256 in 2 : vector<1x8x8xf32>, vector<1x8x8xf32>, vector<1x8x8xf32>, vector<1x8x8xf32> -> vector<1x8x32xf32>
    %258 = vector.shape_cast %257 : vector<1x8x32xf32> to vector<8x32xf32>
    %259 = arith.truncf %258 : vector<8x32xf32> to vector<8x32xbf16>
    %cst_88 = arith.constant dense<0.000000e+00> : vector<8x32xf32>
    %260 = tpu.matmul %259, %155, %cst_88 {dimension_numbers = #tpu.dot_dimension_numbers<[1], [0], [0], [1], [0, 0, 1, 1], [], []>} : vector<8x32xbf16>, vector<32x32xbf16>, vector<8x32xf32> -> vector<8x32xf32>
    %261 = vector.broadcast %156 : vector<1x32xf32> to vector<8x32xf32>
    %262 = arith.addf %260, %261 : vector<8x32xf32>
    %263 = arith.addf %262, %151 : vector<8x32xf32>
    %c0_89 = arith.constant 0 : index
    %c0_90 = arith.constant 0 : index
    %264 = vector.load %arg18[%c0_89, %c0_90] : memref<1x32xf32, #tpu.memory_space<vmem>>, vector<1x32xf32>
    %c0_91 = arith.constant 0 : index
    %c0_92 = arith.constant 0 : index
    %265 = vector.load %arg19[%c0_91, %c0_92] : memref<1x32xf32, #tpu.memory_space<vmem>>, vector<1x32xf32>
    %cst_93 = arith.constant dense<0.000000e+00> : vector<8xf32>
    %266 = vector.multi_reduction <add>, %263, %cst_93 [1] : vector<8x32xf32> to vector<8xf32>
    %267 = vector.shape_cast %266 : vector<8xf32> to vector<8x1xf32>
    %cst_94 = arith.constant 3.200000e+01 : f32
    %268 = vector.broadcast %cst_94 : f32 to vector<8x1xf32>
    %269 = arith.divf %267, %268 : vector<8x1xf32>
    %270 = vector.broadcast %269 : vector<8x1xf32> to vector<8x32xf32>
    %271 = arith.subf %263, %270 : vector<8x32xf32>
    %272 = arith.mulf %271, %271 : vector<8x32xf32>
    %cst_95 = arith.constant dense<0.000000e+00> : vector<8xf32>
    %273 = vector.multi_reduction <add>, %272, %cst_95 [1] : vector<8x32xf32> to vector<8xf32>
    %274 = vector.shape_cast %273 : vector<8xf32> to vector<8x1xf32>
    %cst_96 = arith.constant 3.200000e+01 : f32
    %275 = vector.broadcast %cst_96 : f32 to vector<8x1xf32>
    %276 = arith.divf %274, %275 : vector<8x1xf32>
    %cst_97 = arith.constant 9.99999974E-6 : f32
    %277 = vector.broadcast %cst_97 : f32 to vector<8x1xf32>
    %278 = arith.addf %276, %277 : vector<8x1xf32>
    %279 = math.rsqrt %278 : vector<8x1xf32>
    %280 = vector.broadcast %279 : vector<8x1xf32> to vector<8x32xf32>
    %281 = arith.mulf %271, %280 : vector<8x32xf32>
    %282 = vector.broadcast %264 : vector<1x32xf32> to vector<8x32xf32>
    %283 = arith.mulf %281, %282 : vector<8x32xf32>
    %284 = vector.broadcast %265 : vector<1x32xf32> to vector<8x32xf32>
    %285 = arith.addf %283, %284 : vector<8x32xf32>
    %286 = arith.truncf %285 : vector<8x32xf32> to vector<8x32xbf16>
    %c0_98 = arith.constant 0 : index
    %c0_99 = arith.constant 0 : index
    %287 = vector.load %arg20[%c0_98, %c0_99] : memref<32x128xbf16, #tpu.memory_space<vmem>>, vector<32x128xbf16>
    %cst_100 = arith.constant dense<0.000000e+00> : vector<8x128xf32>
    %288 = tpu.matmul %286, %287, %cst_100 {dimension_numbers = #tpu.dot_dimension_numbers<[1], [0], [0], [1], [0, 0, 1, 1], [], []>} : vector<8x32xbf16>, vector<32x128xbf16>, vector<8x128xf32> -> vector<8x128xf32>
    %c0_101 = arith.constant 0 : index
    %c0_102 = arith.constant 0 : index
    %289 = vector.load %arg21[%c0_101, %c0_102] : memref<1x128xf32, #tpu.memory_space<vmem>>, vector<1x128xf32>
    %290 = vector.broadcast %289 : vector<1x128xf32> to vector<8x128xf32>
    %291 = arith.addf %288, %290 : vector<8x128xf32>
    %cst_103 = arith.constant 0.000000e+00 : f32
    %292 = vector.broadcast %cst_103 : f32 to vector<8x128xf32>
    %293 = arith.maximumf %291, %292 : vector<8x128xf32>
    %294 = arith.truncf %293 : vector<8x128xf32> to vector<8x128xbf16>
    %c0_104 = arith.constant 0 : index
    %c0_105 = arith.constant 0 : index
    %295 = vector.load %arg22[%c0_104, %c0_105] : memref<128x32xbf16, #tpu.memory_space<vmem>>, vector<128x32xbf16>
    %cst_106 = arith.constant dense<0.000000e+00> : vector<8x32xf32>
    %296 = tpu.matmul %294, %295, %cst_106 {dimension_numbers = #tpu.dot_dimension_numbers<[1], [0], [0], [1], [0, 0, 1, 1], [], []>} : vector<8x128xbf16>, vector<128x32xbf16>, vector<8x32xf32> -> vector<8x32xf32>
    %c0_107 = arith.constant 0 : index
    %c0_108 = arith.constant 0 : index
    %297 = vector.load %arg23[%c0_107, %c0_108] : memref<1x32xf32, #tpu.memory_space<vmem>>, vector<1x32xf32>
    %298 = vector.broadcast %297 : vector<1x32xf32> to vector<8x32xf32>
    %299 = arith.addf %296, %298 : vector<8x32xf32>
    %300 = arith.addf %299, %285 : vector<8x32xf32>
    %c0_109 = arith.constant 0 : index
    %c0_110 = arith.constant 0 : index
    %301 = vector.load %arg24[%c0_109, %c0_110] : memref<1x32xf32, #tpu.memory_space<vmem>>, vector<1x32xf32>
    %c0_111 = arith.constant 0 : index
    %c0_112 = arith.constant 0 : index
    %302 = vector.load %arg25[%c0_111, %c0_112] : memref<1x32xf32, #tpu.memory_space<vmem>>, vector<1x32xf32>
    %cst_113 = arith.constant dense<0.000000e+00> : vector<8xf32>
    %303 = vector.multi_reduction <add>, %300, %cst_113 [1] : vector<8x32xf32> to vector<8xf32>
    %304 = vector.shape_cast %303 : vector<8xf32> to vector<8x1xf32>
    %cst_114 = arith.constant 3.200000e+01 : f32
    %305 = vector.broadcast %cst_114 : f32 to vector<8x1xf32>
    %306 = arith.divf %304, %305 : vector<8x1xf32>
    %307 = vector.broadcast %306 : vector<8x1xf32> to vector<8x32xf32>
    %308 = arith.subf %300, %307 : vector<8x32xf32>
    %309 = arith.mulf %308, %308 : vector<8x32xf32>
    %cst_115 = arith.constant dense<0.000000e+00> : vector<8xf32>
    %310 = vector.multi_reduction <add>, %309, %cst_115 [1] : vector<8x32xf32> to vector<8xf32>
    %311 = vector.shape_cast %310 : vector<8xf32> to vector<8x1xf32>
    %cst_116 = arith.constant 3.200000e+01 : f32
    %312 = vector.broadcast %cst_116 : f32 to vector<8x1xf32>
    %313 = arith.divf %311, %312 : vector<8x1xf32>
    %cst_117 = arith.constant 9.99999974E-6 : f32
    %314 = vector.broadcast %cst_117 : f32 to vector<8x1xf32>
    %315 = arith.addf %313, %314 : vector<8x1xf32>
    %316 = math.rsqrt %315 : vector<8x1xf32>
    %317 = vector.broadcast %316 : vector<8x1xf32> to vector<8x32xf32>
    %318 = arith.mulf %308, %317 : vector<8x32xf32>
    %319 = vector.broadcast %301 : vector<1x32xf32> to vector<8x32xf32>
    %320 = arith.mulf %318, %319 : vector<8x32xf32>
    %321 = vector.broadcast %302 : vector<1x32xf32> to vector<8x32xf32>
    %322 = arith.addf %320, %321 : vector<8x32xf32>
    %323 = vector.shape_cast %322 : vector<8x32xf32> to vector<1x8x32xf32>
    %c0_118 = arith.constant 0 : index
    %c0_119 = arith.constant 0 : index
    %c0_120 = arith.constant 0 : index
    %324 = vector.load %arg26[%c0_118, %c0_119, %c0_120] : memref<1x8x32xf32, #tpu.memory_space<vmem>>, vector<1x8x32xf32>
    tpu.vector_store %arg26[%c0_118, %c0_119, %c0_120], %323 {strides = array<i32>} : memref<1x8x32xf32, #tpu.memory_space<vmem>>, vector<1x8x32xf32>,
    return
  }
  func.func @transform_0(%arg0: i32) -> (i32, i32, i32) {
    %c0_i32 = arith.constant 0 : i32
    %c0_i32_0 = arith.constant 0 : i32
    %c0_i32_1 = arith.constant 0 : i32
    return %arg0, %c0_i32, %c0_i32_0 : i32, i32, i32
  }
  func.func @transform_1(%arg0: i32) -> (i32, i32, i32) {
    %c0_i32 = arith.constant 0 : i32
    %c0_i32_0 = arith.constant 0 : i32
    %c0_i32_1 = arith.constant 0 : i32
    return %arg0, %c0_i32, %c0_i32_0 : i32, i32, i32
  }
  func.func @transform_2(%arg0: i32) -> (i32, i32, i32) {
    %c0_i32 = arith.constant 0 : i32
    %c0_i32_0 = arith.constant 0 : i32
    %c0_i32_1 = arith.constant 0 : i32
    return %arg0, %c0_i32, %c0_i32_0 : i32, i32, i32
  }
  func.func @transform_3(%arg0: i32) -> (i32, i32, i32) {
    %c0_i32 = arith.constant 0 : i32
    %c0_i32_0 = arith.constant 0 : i32
    %c0_i32_1 = arith.constant 0 : i32
    return %arg0, %c0_i32, %c0_i32_0 : i32, i32, i32
  }
  func.func @transform_4(%arg0: i32) -> (i32, i32, i32) {
    %c0_i32 = arith.constant 0 : i32
    %c0_i32_0 = arith.constant 0 : i32
    %c0_i32_1 = arith.constant 0 : i32
    return %arg0, %c0_i32, %c0_i32_0 : i32, i32, i32
  }
  func.func @transform_5(%arg0: i32) -> (i32, i32) {
    %c0_i32 = arith.constant 0 : i32
    %c0_i32_0 = arith.constant 0 : i32
    %c0_i32_1 = arith.constant 0 : i32
    return %c0_i32, %c0_i32_0 : i32, i32
  }
  func.func @transform_6(%arg0: i32) -> (i32, i32) {
    %c0_i32 = arith.constant 0 : i32
    %c0_i32_0 = arith.constant 0 : i32
    %c0_i32_1 = arith.constant 0 : i32
    return %c0_i32, %c0_i32_0 : i32, i32
  }
  func.func @transform_7(%arg0: i32) -> (i32, i32) {
    %c0_i32 = arith.constant 0 : i32
    %c0_i32_0 = arith.constant 0 : i32
    %c0_i32_1 = arith.constant 0 : i32
    return %c0_i32, %c0_i32_0 : i32, i32
  }
  func.func @transform_8(%arg0: i32) -> (i32, i32) {
    %c0_i32 = arith.constant 0 : i32
    %c0_i32_0 = arith.constant 0 : i32
    %c0_i32_1 = arith.constant 0 : i32
    return %c0_i32, %c0_i32_0 : i32, i32
  }
  func.func @transform_9(%arg0: i32) -> (i32, i32) {
    %c0_i32 = arith.constant 0 : i32
    %c0_i32_0 = arith.constant 0 : i32
    %c0_i32_1 = arith.constant 0 : i32
    return %c0_i32, %c0_i32_0 : i32, i32
  }
  func.func @transform_10(%arg0: i32) -> (i32, i32) {
    %c0_i32 = arith.constant 0 : i32
    %c0_i32_0 = arith.constant 0 : i32
    %c0_i32_1 = arith.constant 0 : i32
    return %c0_i32, %c0_i32_0 : i32, i32
  }
  func.func @transform_11(%arg0: i32) -> (i32, i32) {
    %c0_i32 = arith.constant 0 : i32
    %c0_i32_0 = arith.constant 0 : i32
    %c0_i32_1 = arith.constant 0 : i32
    return %c0_i32, %c0_i32_0 : i32, i32
  }
  func.func @transform_12(%arg0: i32) -> (i32, i32) {
    %c0_i32 = arith.constant 0 : i32
    %c0_i32_0 = arith.constant 0 : i32
    %c0_i32_1 = arith.constant 0 : i32
    return %c0_i32, %c0_i32_0 : i32, i32
  }
  func.func @transform_13(%arg0: i32) -> (i32, i32) {
    %c0_i32 = arith.constant 0 : i32
    %c0_i32_0 = arith.constant 0 : i32
    %c0_i32_1 = arith.constant 0 : i32
    return %c0_i32, %c0_i32_0 : i32, i32
  }
  func.func @transform_14(%arg0: i32) -> (i32, i32) {
    %c0_i32 = arith.constant 0 : i32
    %c0_i32_0 = arith.constant 0 : i32
    %c0_i32_1 = arith.constant 0 : i32
    return %c0_i32, %c0_i32_0 : i32, i32
  }
  func.func @transform_15(%arg0: i32) -> (i32, i32) {
    %c0_i32 = arith.constant 0 : i32
    %c0_i32_0 = arith.constant 0 : i32
    %c0_i32_1 = arith.constant 0 : i32
    return %c0_i32, %c0_i32_0 : i32, i32
  }
  func.func @transform_16(%arg0: i32) -> (i32, i32) {
    %c0_i32 = arith.constant 0 : i32
    %c0_i32_0 = arith.constant 0 : i32
    %c0_i32_1 = arith.constant 0 : i32
    return %c0_i32, %c0_i32_0 : i32, i32
  }
  func.func @transform_17(%arg0: i32) -> (i32, i32) {
    %c0_i32 = arith.constant 0 : i32
    %c0_i32_0 = arith.constant 0 : i32
    %c0_i32_1 = arith.constant 0 : i32
    return %c0_i32, %c0_i32_0 : i32, i32
  }
  func.func @transform_18(%arg0: i32) -> (i32, i32) {
    %c0_i32 = arith.constant 0 : i32
    %c0_i32_0 = arith.constant 0 : i32
    %c0_i32_1 = arith.constant 0 : i32
    return %c0_i32, %c0_i32_0 : i32, i32
  }
  func.func @transform_19(%arg0: i32) -> (i32, i32) {
    %c0_i32 = arith.constant 0 : i32
    %c0_i32_0 = arith.constant 0 : i32
    %c0_i32_1 = arith.constant 0 : i32
    return %c0_i32, %c0_i32_0 : i32, i32
  }
  func.func @transform_20(%arg0: i32) -> (i32, i32) {
    %c0_i32 = arith.constant 0 : i32
    %c0_i32_0 = arith.constant 0 : i32
    %c0_i32_1 = arith.constant 0 : i32
    return %c0_i32, %c0_i32_0 : i32, i32
  }
  func.func @transform_21(%arg0: i32) -> (i32, i32) {
    %c0_i32 = arith.constant 0 : i32
    %c0_i32_0 = arith.constant 0 : i32
    %c0_i32_1 = arith.constant 0 : i32
    return %c0_i32, %c0_i32_0 : i32, i32
  }
  func.func @transform_22(%arg0: i32) -> (i32, i32) {
    %c0_i32 = arith.constant 0 : i32
    %c0_i32_0 = arith.constant 0 : i32
    %c0_i32_1 = arith.constant 0 : i32
    return %c0_i32, %c0_i32_0 : i32, i32
  }
  func.func @transform_23(%arg0: i32) -> (i32, i32) {
    %c0_i32 = arith.constant 0 : i32
    %c0_i32_0 = arith.constant 0 : i32
    %c0_i32_1 = arith.constant 0 : i32
    return %c0_i32, %c0_i32_0 : i32, i32
  }
  func.func @transform_24(%arg0: i32) -> (i32, i32) {
    %c0_i32 = arith.constant 0 : i32
    %c0_i32_0 = arith.constant 0 : i32
    %c0_i32_1 = arith.constant 0 : i32
    return %c0_i32, %c0_i32_0 : i32, i32
  }
  func.func @transform_25(%arg0: i32) -> (i32, i32, i32) {
    %c0_i32 = arith.constant 0 : i32
    %c0_i32_0 = arith.constant 0 : i32
    %c0_i32_1 = arith.constant 0 : i32
    return %arg0, %c0_i32, %c0_i32_0 : i32, i32, i32
  }
}

</mosaic_0001>

<bundles_post_ra>
// kernel: decoder_block.1
= control target key start
LH: loop header
LB: loop body
LE: loop exit
PB: predicated region body
PF: predicated region fallthrough
CT: control target
= control target key end

     0   :  { %s4422_s0 = inlined_call_operand.vmem [shape: f32[2,8,32], index: 0, kind: input, shape index: {}]   ;;  %s4423_s1 = inlined_call_operand.vmem [shape: f32[2,8,32], index: 1, kind: input, shape index: {}]   ;;  %s4424_s2 = inlined_call_operand.vmem [shape: f32[2,8,32], index: 2, kind: input, shape index: {}]   ;;  %s4425_s3 = inlined_call_operand.vmem [shape: s32[2,8,8], index: 3, kind: input, shape index: {}]   ;;  %s4426_s4 = inlined_call_operand.vmem [shape: s32[2,8,8], index: 4, kind: input, shape index: {}]   ;;  %s4427_s5 = inlined_call_operand.vmem [shape: bf16[32,32], index: 5, kind: input, shape index: {}]   ;;  %s4428_s6 = inlined_call_operand.vmem [shape: bf16[32,32], index: 6, kind: input, shape index: {}]   ;;  %s4429_s7 = inlined_call_operand.vmem [shape: bf16[32,32], index: 7, kind: input, shape index: {}]   ;;  %s4430_s8 = inlined_call_operand.hbm [shape: bf16[32,32], index: 8, kind: input, shape index: {}]   ;;  %s4431_s9 = inlined_call_operand.vmem [shape: f32[1,32], index: 9, kind: input, shape index: {}]   ;;  %s4432_s10 = inlined_call_operand.hbm [shape: f32[1,32], index: 10, kind: input, shape index: {}]   ;;  %s4433_s11 = inlined_call_operand.hbm [shape: f32[1,32], index: 11, kind: input, shape index: {}]   ;;  %s4434_s12 = inlined_call_operand.vmem [shape: bf16[32,32], index: 12, kind: input, shape index: {}]   ;;  %s4435_s13 = inlined_call_operand.hbm [shape: bf16[32,32], index: 13, kind: input, shape index: {}]   ;;  %s4436_s14 = inlined_call_operand.hbm [shape: bf16[32,32], index: 14, kind: input, shape index: {}]   ;;  %s4437_s15 = inlined_call_operand.vmem [shape: bf16[32,32], index: 15, kind: input, shape index: {}]   ;;  %s4438_s16 = inlined_call_operand.hbm [shape: f32[1,32], index: 16, kind: input, shape index: {}]   ;;  %s4439_s17 = inlined_call_operand.hbm [shape: f32[1,32], index: 17, kind: input, shape index: {}]   ;;  %s4440_s18 = inlined_call_operand.hbm [shape: f32[1,32], index: 18, kind: input, shape index: {}]   ;;  %s4441_s19 = inlined_call_operand.vmem [shape: bf16[32,128], index: 19, kind: input, shape index: {}]   ;;  %s4442_s20 = inlined_call_operand.vmem [shape: f32[1,128], index: 20, kind: input, shape index: {}]   ;;  %s4443_s21 = inlined_call_operand.vmem [shape: bf16[128,32], index: 21, kind: input, shape index: {}]   ;;  %s4444_s22 = inlined_call_operand.vmem [shape: f32[1,32], index: 22, kind: input, shape index: {}]   ;;  %s4445_s23 = inlined_call_operand.vmem [shape: f32[1,32], index: 23, kind: input, shape index: {}]   ;;  %s4446_s24 = inlined_call_operand.vmem [shape: f32[1,32], index: 24, kind: input, shape index: {}]   ;;  %s4447_s25 = inlined_call_operand.hbm [shape: f32[2,8,32], index: 25, kind: output, shape index: {}]  }
   0x1   :  { %4467 = sst [smem:[#allocation29_spill]] %s4422_s0 }
   0x2   :  { %4468 = sst [smem:[#allocation30_spill]] %s4423_s1 }
   0x3   :  { %4469 = sst [smem:[#allocation31_spill]] %s4424_s2 }
   0x4   :  { %4470 = sst [smem:[#allocation32_spill]] %s4425_s3 }
   0x5   :  { %4471 = sst [smem:[#allocation33_spill]] %s4426_s4 }
   0x6   :  { %4472 = sst [smem:[#allocation34_spill]] %s4427_s5 }
   0x7   :  { %4473 = sst [smem:[#allocation35_spill]] %s4428_s6 }
   0x8   :  { %4474 = sst [smem:[#allocation36_spill]] %s4429_s7 }
   0x9   :  { %4475 = sst [smem:[#allocation37_spill]] %s4430_s8 }
   0xa   :  { %4476 = sst [smem:[#allocation38_spill]] %s4431_s9 }
   0xb   :  { %4477 = sst [smem:[#allocation39_spill]] %s4432_s10 }
   0xc   :  { %4478 = sst [smem:[#allocation40_spill]] %s4435_s13 }
   0xd   :  { %4479 = sst [smem:[#allocation41_spill]] %s4438_s16 }
   0xe   :  { %4480 = sst [smem:[#allocation42_spill]] %s4445_s23 }
   0xf   :  { %4481 = sst [smem:[#allocation43_spill]] %s4446_s24 }
  0x10   :  { %4482 = sst [smem:[#allocation44_spill]] %s4447_s25 }
  0x11   :  { %30 = vsyncpa [#allocation3], 0 }
  0x12   :  { %31 = vsyncpa [#allocation6], 0 }
  0x13   :  { %32 = vsyncpa [#allocation9], 0 }
  0x14   :  { %33 = vsyncpa [#allocation12], 0 }
  0x15   :  { %34 = vsyncpa [#allocation15], 0 }
  0x16   :  { %35 = vsyncpa [#allocation4], 0 }
  0x17   :  { %37 = vsyncpa [#allocation4 + $0x1], 0  ;;  %s3818_s29 = smov 0   ;;  %s3820_s2 = smov 0  }
  0x18   :  { %s3822_s6 = smov 0   ;;  %s3824_s30 = smov 0  }
  0x19 LB: > { %4483 = sst [smem:[#allocation23_spill]] %s3655_s29  ;;  %s3839_s7 = sadd.s32 4294967295, %s3667_s30   ;;  %s3667_s30 = sphi %s3824_s30, %s4528_s30   ;;  %s3663_s6 = sphi %s3822_s6, %s4530_s6   ;;  %s3659_s2 = sphi %s3820_s2, %s4532_s2   ;;  %s3655_s29 = sphi %s3818_s29, %s4531_s29  }
  0x1a   : > { %4484 = sst [smem:[#allocation24_spill]] %s3663_s6  ;;  %s2820_s3 = sadd.s32 4294967294, %s3667_s30  }
  0x1b   : > { %4485 = sst [smem:[#allocation25_spill]] %s3667_s30  ;;  %s3843_s26 = sadd.s32 1, %s3667_s30  }
  0x1c   : > { %4486 = sst [smem:[#allocation26_spill]] %s3843_s26  ;;  %s600_s1 = sadd.s32 1, %s3663_s6 }
  0x1d   : > { %s597_s8 = ssub.s32 %s3667_s30, %s3843_s26  ;;  %p610_p0 = scmp.ne.s32.totalorder %s3663_s6, %s3659_s2 }
  0x1e   : > { %p598_p1 = scmp.eq.s32.totalorder %s597_s8, 0  ;;  %p611_p2 = scmp.eq.s32.totalorder %s3839_s7, 1 }
  0x1f   : > { %p616_p3 = scmp.ne.s32.totalorder %s3659_s2, %s3655_s29  ;;  %p617_p4 = scmp.eq.s32.totalorder %s2820_s3, 1 }
  0x20   : > { %s3854_s27 = scalar_select %p598_p1, %s3663_s6, %s600_s1  }
  0x21   : > { %p3856_p5 = por %p611_p2, %p610_p0  ;;  %p3860_p6 = por %p617_p4, %p616_p3 }
  0x22   : > { %4487 = sst [smem:[#allocation27_spill]] %s3854_s27  ;;  %p2821_p7 = scmp.ge.s32.totalorder %s3667_s30, 1 }
  0x23   : > { %s4488_s4 = scalar_select %p3856_p5, 1, 0 }
  0x24   : > { %s4489_s28 = scalar_select %p3860_p6, 1, 0 }
  0x25   : > { %p624_p8 = scmp.lt.s32.totalorder %s3667_s30, 3  ;;  %p4459_p9 = scmp.eq.s32.totalorder %s3839_s7, 0 }
  0x26   : > { %4490 = sst [smem:[#allocation28_spill]] %s4489_s28  ;;  %s3669_s5 = smov [#allocation5]  }
  0x27   : > { %p3867_p10 = pnand %p2821_p7, %p624_p8  ;;  %s662_s0 = sshll.u32 %s3669_s5, 4  ;;  %s663_s0 = int_to_ptr.vmem [resolvable:$true] %s662_s0 }
  0x28   : > { %s3670_s1 = smov [#allocation8]   ;;  %s3671_s27 = smov [#allocation11]  }
  0x29   : > { %s4491_s9 = scalar_select %p3867_p10, 1, 0 }
  0x2a   : > { %p3201_p11 = pneg %p3867_p10  ;;  %s686_s8 = sshll.u32 %s3670_s1, 4  ;;  %s3879_s8 = int_to_ptr.vmem [resolvable:$true] %s686_s8 }
  0x2b   : > { %s3881_s6 = sshll.u32 %s3671_s27, 4  ;;  %s4493_s10 = sld [smem:[#allocation39_spill]]  ;;  %s717_s6 = int_to_ptr.vmem [resolvable:$true] %s3881_s6 }
  0x2c   : > { %p3875_p12 = pnand %p4459_p9, %p3201_p11 }
  0x2e   : > { %p3891_p0 = pneg %p3875_p12 }
  0x31   : > { %s3361_s5 = scalar_lea.hbm %s4493_s10, 16 }
  0x32   : > { %p3362_p13 = scmp.ne.s32.totalorder %s4493_s10, %s3361_s5  ;;  %p3368_p3 = scmp.lt.u32.totalorder %s3361_s5, %s4493_s10 }
  0x34   : > { %p3364_p1 = pnand %p3891_p0, %p3362_p13 }
  0x36   : > { %p3365_p2 = pneg %p3364_p1 }
  0x38   : > { %p3370_p4 = pnand %p3368_p3, %p3365_p2 }
  0x3a   : > { %3373 = shalt.err (!%p3370_p4)
}
  0x3b   : > { %s3374_s26 = scalar_lea.vmem %s663_s0, 16  ;;  %s3381_s29 = scalar_lea.vmem %s663_s0, 32 }
  0x3c   : > { %p3375_p7 = scmp.ne.s32.totalorder %s663_s0, %s3374_s26  ;;  %p3382_p9 = scmp.lt.s32.totalorder %s663_s0, %s663_s0 }
  0x3d   : > { %p3383_p6 = scmp.lt.s32.totalorder %s3381_s29, %s3374_s26 }
  0x3e   : > { %p3377_p8 = pnand %p3375_p7, %p3891_p0 }
  0x3f   : > { %p3384_p5 = por %p3383_p6, %p3382_p9 }
  0x40   : > { %p3378_p11 = pneg %p3377_p8 }
  0x42   : > { %p3385_p10 = pnand %p3384_p5, %p3378_p11 }
  0x44   : > { %3388 = shalt.err (!%p3385_p10)
}
  0x45   : > { %3207 = dma.hbm_to_vmem [thread:$0]  (!%p3875_p12), %s4493_s10, 16, %s663_s0, [#allocation6]  }
  0x46   : > { %s4495_s13 = sld [smem:[#allocation40_spill]] }
  0x4c   : > { %s3389_s27 = scalar_lea.hbm %s4495_s13, 256 }
  0x4d   : > { %p3390_p13 = scmp.ne.s32.totalorder %s4495_s13, %s3389_s27  ;;  %p3396_p5 = scmp.lt.u32.totalorder %s3389_s27, %s4495_s13 }
  0x4f   : > { %p3392_p1 = pnand %p3390_p13, %p3891_p0 }
  0x51   : > { %p3393_p6 = pneg %p3392_p1 }
  0x53   : > { %p3398_p9 = pnand %p3396_p5, %p3393_p6 }
  0x55   : > { %3401 = shalt.err (!%p3398_p9)
}
  0x56   : > { %s3402_s0 = scalar_lea.vmem %s3879_s8, 256  ;;  %p3410_p4 = scmp.lt.s32.totalorder %s3879_s8, %s3879_s8 }
  0x57   : > { %p3403_p10 = scmp.ne.s32.totalorder %s3879_s8, %s3402_s0  ;;  %p3411_p7 = scmp.lt.s32.totalorder %s3402_s0, %s3402_s0 }
  0x59   : > { %p3405_p2 = pnand %p3403_p10, %p3891_p0  ;;  %p3412_p8 = por %p3411_p7, %p3410_p4 }
  0x5b   : > { %p3406_p3 = pneg %p3405_p2 }
  0x5d   : > { %p3413_p11 = pnand %p3412_p8, %p3406_p3 }
  0x5f   : > { %3416 = shalt.err (!%p3413_p11)
}
  0x60   : > { %s4462_s23 = smov 64   ;;  %s4464_s24 = smov 4  }
  0x61   : > { %3213 = dma.hbm_to_vmem [thread:$0]  (!%p3875_p12), %s4495_s13, 256, %s3879_s8, [#allocation9], %s4462_s23, %s4462_s23, %s4464_s24  }
  0x62   : > { %s4496_s16 = sld [smem:[#allocation41_spill]] }
  0x68   : > { %s3417_s27 = scalar_lea.hbm %s4496_s16, 16 }
  0x69   : > { %p3418_p13 = scmp.ne.s32.totalorder %s4496_s16, %s3417_s27  ;;  %p3424_p5 = scmp.lt.u32.totalorder %s3417_s27, %s4496_s16 }
  0x6b   : > { %p3420_p1 = pnand %p3418_p13, %p3891_p0 }
  0x6d   : > { %p3421_p6 = pneg %p3420_p1 }
  0x6f   : > { %p3426_p9 = pnand %p3424_p5, %p3421_p6 }
  0x71   : > { %3429 = shalt.err (!%p3426_p9)
}
  0x72   : > { %s3430_s30 = scalar_lea.vmem %s717_s6, 16  ;;  %s3437_s8 = scalar_lea.vmem %s717_s6, 32 }
  0x73   : > { %p3431_p10 = scmp.ne.s32.totalorder %s717_s6, %s3430_s30  ;;  %p3438_p4 = scmp.lt.s32.totalorder %s717_s6, %s717_s6 }
  0x74   : > { %p3439_p7 = scmp.lt.s32.totalorder %s3437_s8, %s3430_s30 }
  0x75   : > { %p3433_p2 = pnand %p3431_p10, %p3891_p0 }
  0x76   : > { %p3440_p8 = por %p3439_p7, %p3438_p4 }
  0x77   : > { %p3434_p3 = pneg %p3433_p2 }
  0x79   : > { %p3441_p11 = pnand %p3440_p8, %p3434_p3 }
  0x7b   : > { %3444 = shalt.err (!%p3441_p11)
}
  0x7c   : > { %3219 = dma.hbm_to_vmem [thread:$0]  (!%p3875_p12), %s4496_s16, 16, %s717_s6, [#allocation12]  }
  0x7d   : > { %s3674_s10 = smov [#allocation2]   ;;  %s3675_s27 = smov [#allocation7]  }
  0x7e   : > { %s645_s1 = sshll.u32 %s3674_s10, 4  ;;  %s673_s26 = sshll.u32 %s3675_s27, 4  ;;  %s646_s1 = int_to_ptr.vmem [resolvable:$true] %s645_s1  ;;  %s674_s26 = int_to_ptr.vmem [resolvable:$true] %s673_s26 }
  0x7f   : > { %s4497_s23 = sld [smem:[#allocation37_spill]] }
  0x85   : > { %s3445_s24 = scalar_lea.hbm %s4497_s23, 256 }
  0x86   : > { %p3446_p13 = scmp.ne.s32.totalorder %s4497_s23, %s3445_s24  ;;  %p3452_p5 = scmp.lt.u32.totalorder %s3445_s24, %s4497_s23 }
  0x88   : > { %p3448_p1 = pnand %p3446_p13, %p3891_p0 }
  0x8a   : > { %p3449_p6 = pneg %p3448_p1 }
  0x8c   : > { %p3454_p9 = pnand %p3452_p5, %p3449_p6 }
  0x8e   : > { %3457 = shalt.err (!%p3454_p9)
}
  0x8f   : > { %s3458_s6 = scalar_lea.vmem %s646_s1, 256  ;;  %p3466_p4 = scmp.lt.s32.totalorder %s646_s1, %s646_s1 }
  0x90   : > { %p3459_p10 = scmp.ne.s32.totalorder %s646_s1, %s3458_s6  ;;  %p3467_p7 = scmp.lt.s32.totalorder %s3458_s6, %s3458_s6 }
  0x92   : > { %p3461_p2 = pnand %p3459_p10, %p3891_p0  ;;  %p3468_p8 = por %p3467_p7, %p3466_p4 }
  0x94   : > { %p3462_p3 = pneg %p3461_p2 }
  0x96   : > { %p3469_p11 = pnand %p3468_p8, %p3462_p3 }
  0x98   : > { %3472 = shalt.err (!%p3469_p11)
}
  0x99   : > { %s4498_s5 = smov 4   ;;  %s4499_s10 = smov 64  }
  0x9a   : > { %3204 = dma.hbm_to_vmem [thread:$0]  (!%p3875_p12), %s4497_s23, 256, %s646_s1, [#allocation3], %s4499_s10, %s4499_s10, %s4498_s5  }
  0x9b   : > { %s3473_s0 = scalar_lea.hbm %s4433_s11, 16 }
  0x9c   : > { %p3474_p13 = scmp.ne.s32.totalorder %s4433_s11, %s3473_s0  ;;  %p3480_p5 = scmp.lt.u32.totalorder %s3473_s0, %s4433_s11 }
  0x9e   : > { %p3476_p1 = pnand %p3474_p13, %p3891_p0 }
  0xa0   : > { %p3477_p6 = pneg %p3476_p1 }
  0xa2   : > { %p3482_p9 = pnand %p3480_p5, %p3477_p6 }
  0xa4   : > { %3485 = shalt.err (!%p3482_p9)
}
  0xa5   : > { %s3486_s13 = scalar_lea.vmem %s674_s26, 16  ;;  %s3493_s1 = scalar_lea.vmem %s674_s26, 32 }
  0xa6   : > { %p3487_p10 = scmp.ne.s32.totalorder %s674_s26, %s3486_s13  ;;  %p3494_p4 = scmp.lt.s32.totalorder %s674_s26, %s674_s26 }
  0xa7   : > { %p3495_p7 = scmp.lt.s32.totalorder %s3493_s1, %s3486_s13 }
  0xa8   : > { %p3489_p2 = pnand %p3487_p10, %p3891_p0 }
  0xa9   : > { %p3496_p8 = por %p3495_p7, %p3494_p4 }
  0xaa   : > { %p3490_p3 = pneg %p3489_p2 }
  0xac   : > { %p3497_p11 = pnand %p3496_p8, %p3490_p3 }
  0xae   : > { %3500 = shalt.err (!%p3497_p11)
}
  0xaf   : > { %3210 = dma.hbm_to_vmem [thread:$0]  (!%p3875_p12), %s4433_s11, 16, %s674_s26, [#allocation6]  }
  0xb0   : > { %s3676_s29 = smov [#allocation10]   ;;  %s3677_s30 = smov [#allocation13]  }
  0xb1   : > { %s699_s0 = sshll.u32 %s3676_s29, 4  ;;  %s727_s8 = sshll.u32 %s3677_s30, 4  ;;  %s700_s0 = int_to_ptr.vmem [resolvable:$true] %s699_s0  ;;  %s728_s8 = int_to_ptr.vmem [resolvable:$true] %s727_s8 }
  0xb2   : > { %s3501_s16 = scalar_lea.hbm %s4436_s14, 256 }
  0xb3   : > { %p3502_p13 = scmp.ne.s32.totalorder %s4436_s14, %s3501_s16  ;;  %p3508_p5 = scmp.lt.u32.totalorder %s3501_s16, %s4436_s14 }
  0xb5   : > { %p3504_p1 = pnand %p3502_p13, %p3891_p0 }
  0xb7   : > { %p3505_p6 = pneg %p3504_p1 }
  0xb9   : > { %p3510_p9 = pnand %p3508_p5, %p3505_p6 }
  0xbb   : > { %3513 = shalt.err (!%p3510_p9)
}
  0xbc   : > { %s3514_s26 = scalar_lea.vmem %s700_s0, 256  ;;  %p3522_p4 = scmp.lt.s32.totalorder %s700_s0, %s700_s0 }
  0xbd   : > { %p3515_p10 = scmp.ne.s32.totalorder %s700_s0, %s3514_s26  ;;  %p3523_p7 = scmp.lt.s32.totalorder %s3514_s26, %s3514_s26 }
  0xbf   : > { %p3517_p2 = pnand %p3515_p10, %p3891_p0  ;;  %p3524_p8 = por %p3523_p7, %p3522_p4 }
  0xc1   : > { %p3518_p3 = pneg %p3517_p2 }
  0xc3   : > { %p3525_p11 = pnand %p3524_p8, %p3518_p3 }
  0xc5   : > { %3528 = shalt.err (!%p3525_p11)
}
  0xc6   : > { %3216 = dma.hbm_to_vmem [thread:$0]  (!%p3875_p12), %s4436_s14, 256, %s700_s0, [#allocation9], %s4499_s10, %s4499_s10, %s4498_s5  }
  0xc7   : > { %s3529_s30 = scalar_lea.hbm %s4439_s17, 16 }
  0xc8   : > { %p3530_p13 = scmp.ne.s32.totalorder %s4439_s17, %s3529_s30  ;;  %p3536_p5 = scmp.lt.u32.totalorder %s3529_s30, %s4439_s17 }
  0xca   : > { %p3532_p1 = pnand %p3530_p13, %p3891_p0 }
  0xcc   : > { %p3533_p6 = pneg %p3532_p1 }
  0xce   : > { %p3538_p9 = pnand %p3536_p5, %p3533_p6 }
  0xd0   : > { %3541 = shalt.err (!%p3538_p9)
}
  0xd1   : > { %s3542_s24 = scalar_lea.vmem %s728_s8, 16  ;;  %s3549_s5 = scalar_lea.vmem %s728_s8, 32 }
  0xd2   : > { %p3543_p10 = scmp.ne.s32.totalorder %s728_s8, %s3542_s24  ;;  %p3550_p4 = scmp.lt.s32.totalorder %s728_s8, %s728_s8 }
  0xd3   : > { %p3551_p7 = scmp.lt.s32.totalorder %s3549_s5, %s3542_s24 }
  0xd4   : > { %p3545_p2 = pnand %p3543_p10, %p3891_p0 }
  0xd5   : > { %p3552_p8 = por %p3551_p7, %p3550_p4 }
  0xd6   : > { %p3546_p3 = pneg %p3545_p2 }
  0xd8   : > { %p3553_p11 = pnand %p3552_p8, %p3546_p3 }
  0xda   : > { %3556 = shalt.err (!%p3553_p11)
}
  0xdb   : > { %3222 = dma.hbm_to_vmem [thread:$0]  (!%p3875_p12), %s4439_s17, 16, %s728_s8, [#allocation12]  }
  0xdc   : > { %s3678_s26 = smov [#allocation14]   ;;  %s3557_s29 = scalar_lea.hbm %s4440_s18, 16 }
  0xdd   : > { %s738_s23 = sshll.u32 %s3678_s26, 4  ;;  %p3558_p13 = scmp.ne.s32.totalorder %s4440_s18, %s3557_s29  ;;  %s739_s23 = int_to_ptr.vmem [resolvable:$true] %s738_s23 }
  0xde   : > { %p3564_p5 = scmp.lt.u32.totalorder %s3557_s29, %s4440_s18 }
  0xdf   : > { %p3560_p1 = pnand %p3558_p13, %p3891_p0 }
  0xe1   : > { %p3561_p6 = pneg %p3560_p1 }
  0xe3   : > { %p3566_p9 = pnand %p3564_p5, %p3561_p6 }
  0xe5   : > { %3569 = shalt.err (!%p3566_p9)
}
  0xe6   : > { %s3570_s8 = scalar_lea.vmem %s739_s23, 16  ;;  %s3577_s1 = scalar_lea.vmem %s739_s23, 32 }
  0xe7   : > { %p3571_p10 = scmp.ne.s32.totalorder %s739_s23, %s3570_s8  ;;  %p3578_p4 = scmp.lt.s32.totalorder %s739_s23, %s739_s23 }
  0xe8   : > { %p3579_p7 = scmp.lt.s32.totalorder %s3577_s1, %s3570_s8 }
  0xe9   : > { %p3573_p2 = pnand %p3571_p10, %p3891_p0 }
  0xea   : > { %p3580_p8 = por %p3579_p7, %p3578_p4 }
  0xeb   : > { %p3574_p3 = pneg %p3573_p2 }
  0xed   : > { %p3581_p11 = pnand %p3580_p8, %p3574_p3 }
  0xef   : > { %3584 = shalt.err (!%p3581_p11)
}
  0xf0   : > { %3225 = dma.hbm_to_vmem [thread:$0]  (!%p3875_p12), %s4440_s18, 16, %s739_s23, [#allocation15]  }
  0xf1   : > { %p4500_p13 = scmp.ne.s32.totalorder %s4491_s9, 0 }
  0xf2   : > { %p4501_p1 = scmp.eq.s32.totalorder (!%p4500_p13), %s3839_s7, 0 }
  0xf3   : > { %804 = sbr.rel (%p4500_p13) target bundleno = 4532 (0x11b4), region = 120 }
  0xfa   : > { %3630 = dma.done.wait (%p4501_p1), [#allocation3], 256   ;;  %p4502_p0 = pmov %p4501_p1 }
  0xfc   : > { %3632 = vsyncadd (%p4502_p0), [#allocation3], 4294967040  ;;  %p4503_p6 = pmov %p4502_p0 }
  0xfd   : > { %p4504_p5 = pmov %p4502_p0 }
  0xfe   : > { %3634 = dma.done.wait (%p4503_p6), [#allocation6], 32  }
  0xff   : > { %3636 = vsyncadd (%p4504_p5), [#allocation6], 4294967264  ;;  %p4505_p9 = pmov %p4502_p0 }
 0x100   : > { %p4506_p12 = pmov %p4502_p0 }
 0x101   : > { %3638 = dma.done.wait (%p4505_p9), [#allocation9], 512  }
 0x102   : > { %3640 = vsyncadd (%p4506_p12), [#allocation9], 4294966784  ;;  %p4507_p10 = pmov %p4502_p0 }
 0x103   : > { %p4508_p2 = pmov %p4502_p0 }
 0x104   : > { %3642 = dma.done.wait (%p4507_p10), [#allocation12], 32  }
 0x105   : > { %3644 = vsyncadd (%p4508_p2), [#allocation12], 4294967264  ;;  %p4509_p3 = pmov %p4502_p0 }
 0x106   : > { %p4510_p4 = pmov %p4502_p0 }
 0x107   : > { %3646 = dma.done.wait (%p4509_p3), [#allocation15], 16  }
 0x108   : > { %3648 = vsyncadd (%p4510_p4), [#allocation15], 4294967280  ;;  %p915_p7 = scmp.lt.s32.totalorder %s3839_s7, 1  ;;  %v3679_v0 = vmov 0.0   ;;  %vm3680_vm0 = vmmov 0   ;;  %s4511_s0 = sld [smem:[#allocation29_spill]] }
 0x109   : > { %2979 = vmatprep.subr.bf16.mxu0 %v3679_v0  ;;  %2983 = vmatprep.mubr.msk.bf16.mxu0 %vm3680_vm0, %v3679_v0  ;;  %s4512_s27 = sld [smem:[#allocation34_spill]]  ;;  %vm975_vm1 = vcmask 261120   ;;  %s4513_s13 = sld [smem:[#allocation35_spill]]  ;;  %vm1127_vm2 = vcmask 64512   ;;  %vm1189_vm4 = vcmask 1043456   ;;  %vm1579_vm5 = vcmask 130048  }
 0x10a   : > { %s916_s25 = scalar_select %p915_p7, %s3839_s7, 1  ;;  %3003 = vmatprep.subr.bf16.mxu1 %v3679_v0  ;;  %3005 = vmatprep.mubr.msk.bf16.mxu1 %vm3680_vm0, %v3679_v0  ;;  %vm1581_vm6 = vcmask 195584  }
 0x10b   : > { %s3681_s24 = smov 112   ;;  %s3682_s5 = smov 120  }
 0x10c   : > { %s4078_s9 = sshll.u32 %s916_s25, 3  ;;  %s3683_s25 = smov 104  }
 0x10d   : > { %s4515_s30 = sld [smem:[#allocation32_spill]]  ;;  %s3684_s6 = smov 8  }
 0x10e   : > { %s918_s26 = scalar_lea.vmem %s4511_s0, %s4078_s9  ;;  %s4514_s0 = sld [smem:[#allocation36_spill]] }
 0x10f   : > { %v3297_v1 = vld [vmem:[%s4512_s27] sm:$0xff]   ;;  %v3298_v2 = vld [vmem:[%s4512_s27 + $0x8] sm:$0xff]   ;;  %s3685_s8 = smov 16   ;;  %s3686_s1 = smov 24  }
 0x110   : > { %2980 = vmatpush3.bf16.msra.mxu0 %v3297_v1  ;;  %v4090_v3 = vld [vmem:[%s918_s26] sm:$0xff]  ;;  %v3300_v6 = vld [vmem:[%s4513_s13 + $0x8] sm:$0xff]   ;;  %s4516_s26 = sld [smem:[#allocation38_spill]]  ;;  %s4519_s10 = sld [smem:[#allocation33_spill]] }
 0x111   : > { %2981 = vmatprep.subr.bf16.mxu0 %v3679_v0  ;;  %v3299_v4 = vld [vmem:[%s4513_s13] sm:$0xff]   ;;  %v962_v5 = vpack.c.bf16 %v4090_v3, %v4090_v3  ;;  %s4517_s29 = sld [smem:[#allocation30_spill]]  ;;  %p4523_p11 = scmp.ne.s32.totalorder %s4488_s4, 0 }
 0x113   : > { %s930_s28 = scalar_lea.vmem %s4515_s30, %s4078_s9 }
 0x114   : > { %2982 = vmatpush3.bf16.msra.mxu0 %v3298_v2  ;;  %v3301_v19 = vld [vmem:[%s4514_s0] sm:$0xff]   ;;  %v3302_v20 = vld [vmem:[%s4514_s0 + $0x8] sm:$0xff]  }
 0x115   : > { %2987 = vmatprep.subr.bf16.mxu0 %v3679_v0  ;;  %v939_v30 = vld [vmem:[%s930_s28] sm:$0xff]  ;;  %s4522_s28 = sld [smem:[#allocation44_spill]] }
 0x116   : > { %vm940_vm3 = vcmp.eq.s32.totalorder %v939_v30, 0 }
 0x117   : > { %2984 = vmatmul.mubr.msk.bf16.vlgmr.msra.gmra.mrb[0].mxu0 %vm975_vm1, %v962_v5  ;;  %v941_v31 = vsel %vm940_vm3, -1e+20, %v3679_v0  ;;  %s922_s30 = scalar_lea.vmem %s4517_s29, %s4078_s9  ;;  %s4518_s29 = sld [smem:[#allocation31_spill]] }
 0x118   : > { %2988 = vmatpush3.bf16.msra.mxu0 %v3299_v4  ;;  %2991 = vmatprep.mubr.msk.bf16.mxu0 %vm3680_vm0, %v3679_v0 }
 0x119   : > { %2989 = vmatprep.subr.bf16.mxu0 %v3679_v0 }
 0x11c   : > { %2990 = vmatpush3.bf16.msra.mxu0 %v3300_v6 }
 0x11d   : > { %2995 = vmatprep.subr.bf16.mxu0 %v3679_v0 }
 0x11f   : > { %2992 = vmatmul.mubr.msk.bf16.vlgmr.msra.gmra.mrb[4].mxu0 %vm975_vm1, %v962_v5 }
 0x120   : > { %2999 = vmatprep.mubr.msk.bf16.mxu0 %vm3680_vm0, %v3679_v0  ;;  %2996 = vmatpush3.bf16.msra.mxu0 %v3301_v19 }
 0x121   : > { %2997 = vmatprep.subr.bf16.mxu0 %v3679_v0 }
 0x124   : > { %2998 = vmatpush3.bf16.msra.mxu0 %v3302_v20 }
 0x125   : > { %3009 = vmatprep.subr.bf16.mxu0 %v3679_v0 }
 0x127   : > { %3000 = vmatmul.mubr.msk.bf16.vlgmr.msra.gmra.mrb[8].mxu0 %vm975_vm1, %v962_v5 }
 0x128   : > { %3011 = vmatprep.mubr.msk.bf16.mxu0 %vm3680_vm0, %v3679_v0 }
 0x1ea   : > { %v1013_v7 = vpop.f32.mrb[0].mxu0 }
 0x1eb   : > { %v2985_v8 = vpop.f32.mrb[1].mxu0  ;;  %v1019_v12 = vmul.f32 0.17677669, %v1013_v7 }
 0x1ec   : > { %v1016_v9 = vpop.f32.mrb[2].mxu0 }
 0x1ed   : > { %v2986_v10 = vpop.f32.mrb[3].mxu0  ;;  %v1124_v18 = vpack.c.bf16 %v1019_v12, %v1019_v12 }
 0x1f2   : > { %v1066_v11 = vpop.f32.mrb[4].mxu0 }
 0x1f3   : > { %v1125_v13 = vpack.c.bf16 %v1066_v11, %v1066_v11  ;;  %v2993_v14 = vpop.f32.mrb[5].mxu0 }
 0x1f4   : > { %v1069_v15 = vpop.f32.mrb[6].mxu0 }
 0x1f5   : > { %1348 = vrot.lane.b32.xlu1 %v1125_v13, %s3681_s24  ;;  %1237 = vrot.lane.b32.xlu0 %v1125_v13, %s3682_s5  ;;  %v2994_v16 = vpop.f32.mrb[7].mxu0  ;;  %v1132_v17 = vsel %vm1127_vm2, %v1125_v13, 0 }
 0x1f6   : > { %3004 = vmatpush3.bf16.xpose.msra.mxu1 %v1132_v17 }
 0x1f7   : > { %3015 = vmatprep.subr.bf16.mxu1 %v3679_v0 }
 0x1f9   : > { %1346 = vrot.lane.b32.xlu1 %v1124_v18, %s3681_s24  ;;  %1234 = vrot.lane.b32.xlu0 %v1124_v18, %s3682_s5 }
 0x1fa   : > { %v1118_v38 = vpop.f32.mrb[8].mxu0 }
 0x1fb   : > { %v1126_v39 = vpack.c.bf16 %v1118_v38, %v1118_v38  ;;  %v3001_v40 = vpop.f32.mrb[9].mxu0 }
 0x1fc   : > { %v1121_v41 = vpop.f32.mrb[10].mxu0 }
 0x1fd   : > { %1456 = vrot.lane.b32.xlu1 %v1124_v18, %s3683_s25  ;;  %1458 = vrot.lane.b32.xlu0 %v1125_v13, %s3683_s25  ;;  %v3002_v42 = vpop.f32.mrb[11].mxu0  ;;  %v1191_v43 = vsel %vm1189_vm4, %v1126_v39, 0 }
 0x1fe   : > { %3006 = vmatmul.mubr.msk.bf16.vlgmr.msra.gmra.mrb[0].mxu1 %vm1127_vm2, %v1124_v18  ;;  %3010 = vmatpush3.bf16.msra.mxu0 %v1191_v43 }
 0x1ff   : > { %3017 = vmatprep.mubr.msk.bf16.mxu1 %vm3680_vm0, %v3679_v0  ;;  %3021 = vmatprep.subr.bf16.mxu0 %v3679_v0 }
 0x267   : > { %v1238_v21 = vpop.permute.xlu0 %1237  ;;  %v1349_v23 = vpop.permute.xlu1 %1348 }
 0x268   : > { %v1243_v22 = vsel %vm1127_vm2, %v1238_v21, 0  ;;  %v1354_v25 = vsel %vm1127_vm2, %v1349_v23, 0 }
 0x269   : > { %3016 = vmatpush3.bf16.xpose.msra.mxu1 %v1243_v22 }
 0x26a   : > { %3027 = vmatprep.subr.bf16.mxu1 %v3679_v0 }
 0x26b   : > { %v1235_v24 = vpop.permute.xlu0 %1234  ;;  %v1347_v27 = vpop.permute.xlu1 %1346 }
 0x26f   : > { %v1459_v26 = vpop.permute.xlu0 %1458  ;;  %v1457_v29 = vpop.permute.xlu1 %1456 }
 0x270   : > { %3018 = vmatmul.mubr.msk.bf16.vlgmr.msra.gmra.mrb[4].mxu1 %vm1127_vm2, %v1235_v24  ;;  %v1464_v28 = vsel %vm1127_vm2, %v1459_v26, 0 }
 0x271   : > { %3028 = vmatpush3.bf16.xpose.msra.mxu1 %v1354_v25  ;;  %3029 = vmatprep.mubr.msk.bf16.mxu1 %vm3680_vm0, %v3679_v0 }
 0x272   : > { %3039 = vmatprep.subr.bf16.mxu1 %v3679_v0 }
 0x278   : > { %3030 = vmatmul.mubr.msk.bf16.vlgmr.msra.gmra.mrb[8].mxu1 %vm1127_vm2, %v1347_v27 }
 0x279   : > { %3040 = vmatpush3.bf16.xpose.msra.mxu1 %v1464_v28  ;;  %3041 = vmatprep.mubr.msk.bf16.mxu1 %vm3680_vm0, %v3679_v0 }
 0x27a   : > { %3051 = vmatprep.subr.bf16.mxu1 %v3679_v0 }
 0x280   : > { %3042 = vmatmul.mubr.msk.bf16.vlgmr.msra.gmra.mrb[12].mxu1 %vm1127_vm2, %v1457_v29 }
 0x281   : > { %3055 = vmatprep.mubr.msk.bf16.mxu1 %vm3680_vm0, %v3679_v0 }
 0x2d1   : > { %v1168_v32 = vpop.f32.mrb[0].mxu1 }
 0x2d2   : > { %v1169_v33 = vadd.f32 %v1168_v32, %v941_v31  ;;  %v3007_v34 = vpop.f32.mrb[1].mxu1 }
 0x2d3   : > { %v1171_v35 = vpop.f32.mrb[2].mxu1 }
 0x2d4   : > { %v3008_v36 = vpop.f32.mrb[3].mxu1  ;;  %v1174_v37 = vsel %vm1127_vm2, %v1169_v33, -inf }
 0x2d5   : > { %1175 = vmax.xlane.f32.xlu0 %v1174_v37 }
 0x343   : > { %v1279_v44 = vpop.f32.mrb[4].mxu1 }
 0x344   : > { %v1280_v45 = vadd.f32 %v1279_v44, %v941_v31  ;;  %v3019_v46 = vpop.f32.mrb[5].mxu1 }
 0x345   : > { %v1282_v47 = vpop.f32.mrb[6].mxu1  ;;  %v3303_v46 = vld [vmem:[#allocation2] sm:$0xff]  }
 0x346   : > { %v3020_v48 = vpop.f32.mrb[7].mxu1  ;;  %v1285_v49 = vsel %vm1127_vm2, %v1280_v45, -inf  ;;  %3052 = vmatpush3.bf16.msra.mxu1 %v3303_v46 }
 0x347   : > { %1286 = vmax.xlane.f32.xlu1 %v1285_v49  ;;  %3053 = vmatprep.subr.bf16.mxu1 %v3679_v0 }
 0x34b   : > { %v1390_v50 = vpop.f32.mrb[8].mxu1 }
 0x34c   : > { %v1391_v51 = vadd.f32 %v1390_v50, %v941_v31  ;;  %v3031_v52 = vpop.f32.mrb[9].mxu1 }
 0x34d   : > { %v1393_v53 = vpop.f32.mrb[10].mxu1 }
 0x34e   : > { %v3032_v54 = vpop.f32.mrb[11].mxu1  ;;  %v1396_v55 = vsel %vm1127_vm2, %v1391_v51, -inf }
 0x34f   : > { %1397 = vmax.xlane.f32.xlu0 %v1396_v55 }
 0x353   : > { %v1500_v56 = vpop.f32.mrb[12].mxu1 }
 0x354   : > { %v1501_v57 = vadd.f32 %v1500_v56, %v941_v31  ;;  %v3043_v58 = vpop.f32.mrb[13].mxu1 }
 0x355   : > { %v1503_v59 = vpop.f32.mrb[14].mxu1 }
 0x356   : > { %v3044_v60 = vpop.f32.mrb[15].mxu1  ;;  %v1506_v61 = vsel %vm1127_vm2, %v1501_v57, -inf }
 0x357   : > { %1507 = vmax.xlane.f32.xlu0 %v1506_v61 }
 0x362   : > { %v1176_v62 = vpop.xlane.xlu0 %1175 }
 0x363   : > { %v1177_v63 = vsub.f32 %v1169_v33, %v1176_v62 }
 0x365   : > { %v1178_v1 = vmul.f32 1.442695, %v1177_v63 }
 0x367   : > { %3323 = vpow2.f32 %v1178_v1 }
 0x371   : > { %v3324_v2 = vpop.eup %3323 }
 0x372   : > { %v1180_v4 = vsel %vm1127_vm2, %v3324_v2, 0.0 }
 0x373   : > { %1181 = vadd.xlane.f32.xlu1 %v1180_v4 }
 0x384   : > { %1298 = vrot.lane.b32.xlu1 %v1126_v39, %s3682_s5 }
 0x3d4   : > { %v1287_v5 = vpop.xlane.xlu1 %1286 }
 0x3d5   : > { %v1288_v6 = vsub.f32 %v1280_v45, %v1287_v5  ;;  %v2863_v5 = vld [vmem:[%s4516_s26] ss:$0 sm:$0xff]  ;;  %s934_s26 = scalar_lea.vmem %s4519_s10, %s4078_s9  ;;  %s912_s10 = sand.u32 1, %s3659_s2  }
 0x3d7   : > { %v1289_v7 = vmul.f32 1.442695, %v1288_v6 }
 0x3d9   : > { %3325 = vpow2.f32 %v1289_v7 }
 0x3dc   : > { %v1398_v8 = vpop.xlane.xlu0 %1397 }
 0x3dd   : > { %v1399_v9 = vsub.f32 %v1391_v51, %v1398_v8  ;;  %v3304_v51 = vld [vmem:[#allocation2 + $0x8] sm:$0xff]  }
 0x3de   : > { %3054 = vmatpush3.bf16.msra.mxu1 %v3304_v51 }
 0x3df   : > { %v1400_v10 = vmul.f32 1.442695, %v1399_v9  ;;  %3067 = vmatprep.subr.bf16.mxu1 %v3679_v0 }
 0x3e1   : > { %3327 = vpow2.f32 %v1400_v10 }
 0x3e3   : > { %v3326_v11 = vpop.eup %3325 }
 0x3e4   : > { %v1508_v12 = vpop.xlane.xlu0 %1507  ;;  %v1291_v13 = vsel %vm1127_vm2, %v3326_v11, 0.0 }
 0x3e5   : > { %v1509_v14 = vsub.f32 %v1501_v57, %v1508_v12  ;;  %1292 = vadd.xlane.f32.xlu0 %v1291_v13 }
 0x3e7   : > { %v1510_v15 = vmul.f32 1.442695, %v1509_v14 }
 0x3e9   : > { %3329 = vpow2.f32 %v1510_v15 }
 0x3eb   : > { %v3328_v16 = vpop.eup %3327 }
 0x3ec   : > { %v1402_v17 = vsel %vm1127_vm2, %v3328_v16, 0.0 }
 0x3ed   : > { %1403 = vadd.xlane.f32.xlu1 %v1402_v17 }
 0x3f3   : > { %v3330_v18 = vpop.eup %3329 }
 0x3f4   : > { %v1512_v19 = vsel %vm1127_vm2, %v3330_v18, 0.0 }
 0x3f5   : > { %1513 = vadd.xlane.f32.xlu0 %v1512_v19  ;;  %v3306_v19 = vld [vmem:[#allocation8 + $0x8] sm:$0xff]  }
 0x3fe   : > { %1518 = vrot.lane.b32.xlu1 %v1126_v39, %s3683_s25 }
 0x400   : > { %v1182_v20 = vpop.xlane.xlu1 %1181 }
 0x401   : > { %3331 = vrcp.f32 %v1182_v20 }
 0x404   : > { %v1299_v22 = vpop.permute.xlu1 %1298 }
 0x405   : > { %v1304_v25 = vsel %vm1189_vm4, %v1299_v22, 0  ;;  %v3308_v22 = vld [vmem:[%s4434_s12 + $0x8] sm:$0xff]  }
 0x40b   : > { %v3332_v21 = vpop.eup %3331  ;;  %1408 = vrot.lane.b32.xlu0 %v1126_v39, %s3681_s24 }
 0x40c   : > { %v1184_v23 = vmul.f32 %v3332_v21, %v3324_v2  ;;  %v3307_v21 = vld [vmem:[%s4434_s12] sm:$0xff]  }
 0x40e   : > { %v1185_v24 = vpack.c.bf16 %v1184_v23, %v1184_v23 }
 0x410   : > { %3012 = vmatmul.mubr.msk.bf16.vlgmr.msra.gmra.mrb[12].mxu0 %vm1127_vm2, %v1185_v24 }
 0x411   : > { %3022 = vmatpush3.bf16.msra.mxu0 %v1304_v25  ;;  %3023 = vmatprep.mubr.msk.bf16.mxu0 %vm3680_vm0, %v3679_v0 }
 0x412   : > { %3033 = vmatprep.subr.bf16.mxu0 %v3679_v0 }
 0x472   : > { %v1293_v26 = vpop.xlane.xlu0 %1292 }
 0x473   : > { %3333 = vrcp.f32 %v1293_v26 }
 0x47a   : > { %v1404_v27 = vpop.xlane.xlu1 %1403 }
 0x47b   : > { %3335 = vrcp.f32 %v1404_v27  ;;  %v2867_v27 = vld [vmem:[#allocation5] ss:$0 sm:$0xff] }
 0x47d   : > { %v3334_v28 = vpop.eup %3333 }
 0x47e   : > { %v1295_v29 = vmul.f32 %v3334_v28, %v3326_v11  ;;  %v1519_v36 = vpop.permute.xlu1 %1518 }
 0x47f   : > { %v1524_v38 = vsel %vm1189_vm4, %v1519_v36, 0 }
 0x480   : > { %v1296_v30 = vpack.c.bf16 %v1295_v29, %v1295_v29  ;;  %v2868_v29 = vld [vmem:[#allocation7] ss:$0 sm:$0xff] }
 0x482   : > { %v1514_v31 = vpop.xlane.xlu0 %1513  ;;  %3024 = vmatmul.mubr.msk.bf16.vlgmr.msra.gmra.mrb[16].mxu0 %vm1127_vm2, %v1296_v30 }
 0x483   : > { %3337 = vrcp.f32 %v1514_v31  ;;  %3035 = vmatprep.mubr.msk.bf16.mxu0 %vm3680_vm0, %v3679_v0 }
 0x485   : > { %v3336_v32 = vpop.eup %3335 }
 0x486   : > { %v1406_v33 = vmul.f32 %v3336_v32, %v3328_v16  ;;  %v1409_v34 = vpop.permute.xlu0 %1408 }
 0x487   : > { %v1414_v35 = vsel %vm1189_vm4, %v1409_v34, 0 }
 0x488   : > { %3034 = vmatpush3.bf16.msra.mxu0 %v1414_v35  ;;  %v1407_v37 = vpack.c.bf16 %v1406_v33, %v1406_v33 }
 0x489   : > { %3045 = vmatprep.subr.bf16.mxu0 %v3679_v0 }
 0x48b   : > { %3036 = vmatmul.mubr.msk.bf16.vlgmr.msra.gmra.mrb[20].mxu0 %vm1127_vm2, %v1407_v37 }
 0x48c   : > { %3046 = vmatpush3.bf16.msra.mxu0 %v1524_v38  ;;  %3047 = vmatprep.mubr.msk.bf16.mxu0 %vm3680_vm0, %v3679_v0 }
 0x48d   : > { %v3338_v39 = vpop.eup %3337  ;;  %3059 = vmatprep.subr.bf16.mxu0 %v3679_v0 }
 0x48e   : > { %v1516_v40 = vmul.f32 %v3338_v39, %v3330_v18  ;;  %v3305_v18 = vld [vmem:[#allocation8] sm:$0xff]  }
 0x490   : > { %v1517_v41 = vpack.c.bf16 %v1516_v40, %v1516_v40 }
 0x493   : > { %3048 = vmatmul.mubr.msk.bf16.vlgmr.msra.gmra.mrb[24].mxu0 %vm1127_vm2, %v1517_v41 }
 0x494   : > { %3063 = vmatprep.mubr.msk.bf16.mxu0 %vm3680_vm0, %v3679_v0  ;;  %3060 = vmatpush3.bf16.msra.mxu0 %v3307_v21 }
 0x495   : > { %3061 = vmatprep.subr.bf16.mxu0 %v3679_v0 }
 0x498   : > { %3062 = vmatpush3.bf16.msra.mxu0 %v3308_v22 }
 0x499   : > { %3075 = vmatprep.subr.bf16.mxu0 %v3679_v0 }
 0x4e3   : > { %v1227_v42 = vpop.f32.mrb[12].mxu0 }
 0x4e4   : > { %v3013_v43 = vpop.f32.mrb[13].mxu0 }
 0x4e5   : > { %v1230_v44 = vpop.f32.mrb[14].mxu0 }
 0x4e6   : > { %v3014_v45 = vpop.f32.mrb[15].mxu0 }
 0x555   : > { %v1340_v47 = vpop.f32.mrb[16].mxu0 }
 0x556   : > { %1567 = vrot.lane.b32.xlu1 %v1340_v47, %s3684_s6  ;;  %v3025_v48 = vpop.f32.mrb[17].mxu0  ;;  %v3309_v47 = vld [vmem:[#allocation10] sm:$0xff]  }
 0x557   : > { %v1343_v49 = vpop.f32.mrb[18].mxu0  ;;  %v3310_v48 = vld [vmem:[#allocation10 + $0x8] sm:$0xff]  }
 0x558   : > { %v3026_v50 = vpop.f32.mrb[19].mxu0 }
 0x55e   : > { %v1450_v52 = vpop.f32.mrb[20].mxu0 }
 0x55f   : > { %1571 = vrot.lane.b32.xlu0 %v1450_v52, %s3685_s8  ;;  %v3037_v53 = vpop.f32.mrb[21].mxu0 }
 0x560   : > { %v1453_v54 = vpop.f32.mrb[22].mxu0 }
 0x561   : > { %v3038_v55 = vpop.f32.mrb[23].mxu0 }
 0x566   : > { %v1560_v56 = vpop.f32.mrb[24].mxu0 }
 0x567   : > { %1575 = vrot.lane.b32.xlu1 %v1560_v56, %s3686_s1  ;;  %v3049_v57 = vpop.f32.mrb[25].mxu0 }
 0x568   : > { %v1563_v58 = vpop.f32.mrb[26].mxu0 }
 0x569   : > { %v3050_v59 = vpop.f32.mrb[27].mxu0  ;;  %v942_v58 = vld [vmem:[%s934_s26] sm:$0xff]  ;;  %s2840_s26 = sshll.u32 %s912_s10, 3 }
 0x56a   : > { %vm943_vm7 = vcmp.eq.s32.totalorder %v942_v58, 0  ;;  %s914_s23 = scalar_lea.vmem [#allocation16], %s2840_s26 }
 0x56b   : > { %v944_v59 = vsel %vm943_vm7, -1e+20, %v3679_v0  ;;  %s2634_s16 = sshll.u32 %s914_s23, 4  ;;  %s4381_s16 = int_to_ptr.vmem [resolvable:$true] %s2634_s16 }
 0x5c8   : > { %v1568_v60 = vpop.permute.xlu1 %1567 }
 0x5c9   : > { %v1578_v62 = vsel %vm1127_vm2, %v1227_v42, %v1568_v60 }
 0x5d1   : > { %v1572_v61 = vpop.permute.xlu0 %1571 }
 0x5d2   : > { %v1580_v63 = vsel %vm1579_vm5, %v1578_v62, %v1572_v61 }
 0x5d9   : > { %v1576_v1 = vpop.permute.xlu1 %1575 }
 0x5da   : > { %v1582_v2 = vsel %vm1581_vm6, %v1580_v63, %v1576_v1 }
 0x5db   : > { %v1583_v4 = vpack.c.bf16 %v1582_v2, %v1582_v2 }
 0x5dd   : > { %3056 = vmatmul.mubr.msk.bf16.vlgmr.msra.gmra.mrb[16].mxu1 %vm975_vm1, %v1583_v4 }
 0x5de   : > { %3071 = vmatprep.mubr.msk.bf16.mxu1 %vm3680_vm0, %v3679_v0  ;;  %3068 = vmatpush3.bf16.msra.mxu1 %v3305_v18 }
 0x5df   : > { %3069 = vmatprep.subr.bf16.mxu1 %v3679_v0 }
 0x5e2   : > { %3070 = vmatpush3.bf16.msra.mxu1 %v3306_v19 }
 0x5e3   : > { %3083 = vmatprep.subr.bf16.mxu1 %v3679_v0 }
 0x6b0   : > { %v1639_v6 = vpop.f32.mrb[16].mxu1 }
 0x6b1   : > { %v1640_v7 = vadd.f32 %v2863_v5, %v1639_v6  ;;  %v3057_v8 = vpop.f32.mrb[17].mxu1 }
 0x6b2   : > { %v1642_v9 = vpop.f32.mrb[18].mxu1 }
 0x6b3   : > { %v3058_v10 = vpop.f32.mrb[19].mxu1  ;;  %v1645_v11 = vadd.f32 %v1640_v7, %v4090_v3  ;;  %v937_v3 = vld [vmem:[%s922_s30] sm:$0xff]  ;;  %s926_s30 = scalar_lea.vmem %s4518_s29, %s4078_s9  ;;  %s2621_s9 = scalar_lea.sflag [#allocation4], %s912_s10 }
 0x6b4   : > { %v1750_v20 = vpack.c.bf16 %v937_v3, %v937_v3  ;;  %v938_v49 = vld [vmem:[%s926_s30] sm:$0xff] }
 0x6b5   : > { %v1648_v12 = vsel %vm975_vm1, %v1645_v11, 0.0  ;;  %v1806_v50 = vpack.c.bf16 %v938_v49, %v938_v49 }
 0x6b6   : > { %1649 = vadd.xlane.f32.xlu0 %v1648_v12  ;;  %3072 = vmatmul.mubr.msk.bf16.vlgmr.msra.gmra.mrb[20].mxu1 %vm975_vm1, %v1750_v20 }
 0x6b7   : > { %3085 = vmatprep.mubr.msk.bf16.mxu1 %vm3680_vm0, %v3679_v0 }
 0x743   : > { %v1650_v13 = vpop.xlane.xlu0 %1649 }
 0x744   : > { %v1652_v14 = vmul.f32 0.03125, %v1650_v13 }
 0x746   : > { %v1653_v15 = vsub.f32 %v1645_v11, %v1652_v14 }
 0x748   : > { %v1654_v16 = vmul.f32 %v1653_v15, %v1653_v15 }
 0x74a   : > { %v1655_v17 = vsel %vm975_vm1, %v1654_v16, 0.0 }
 0x74b   : > { %1656 = vadd.xlane.f32.xlu1 %v1655_v17 }
 0x789   : > { %v1800_v33 = vpop.f32.mrb[20].mxu1 }
 0x78a   : > { %v1863_v34 = vpack.c.bf16 %v1800_v33, %v1800_v33  ;;  %v3073_v35 = vpop.f32.mrb[21].mxu1 }
 0x78b   : > { %v1803_v36 = vpop.f32.mrb[22].mxu1 }
 0x78c   : > { %1973 = vrot.lane.b32.xlu0 %v1863_v34, %s3682_s5  ;;  %v3074_v37 = vpop.f32.mrb[23].mxu1  ;;  %v1869_v38 = vsel %vm1127_vm2, %v1863_v34, 0 }
 0x78d   : > { %3084 = vmatpush3.bf16.xpose.msra.mxu1 %v1869_v38 }
 0x78e   : > { %3095 = vmatprep.subr.bf16.mxu1 %v3679_v0 }
 0x790   : > { %2084 = vrot.lane.b32.xlu0 %v1863_v34, %s3681_s24 }
 0x794   : > { %2194 = vrot.lane.b32.xlu0 %v1863_v34, %s3683_s25 }
 0x7d8   : > { %v1657_v23 = vpop.xlane.xlu1 %1656 }
 0x7d9   : > { %v1658_v24 = vmul.f32 0.03125, %v1657_v23 }
 0x7db   : > { %v1659_v25 = vadd.f32 1e-05, %v1658_v24 }
 0x7dd   : > { %3339 = vrsqrt.f32 %v1659_v25 }
 0x7e7   : > { %v3340_v26 = vpop.eup %3339 }
 0x7e8   : > { %v1661_v28 = vmul.f32 %v3340_v26, %v1653_v15 }
 0x7ea   : > { %v1668_v30 = vmul.f32 %v2867_v27, %v1661_v28 }
 0x7ec   : > { %v4217_v31 = vadd.f32 %v2868_v29, %v1668_v30 }
 0x7ee   : > { %v1693_v32 = vpack.c.bf16 %v4217_v31, %v4217_v31 }
 0x7f0   : > { %3064 = vmatmul.mubr.msk.bf16.vlgmr.msra.gmra.mrb[28].mxu0 %vm975_vm1, %v1693_v32 }
 0x7f1   : > { %3079 = vmatprep.mubr.msk.bf16.mxu0 %vm3680_vm0, %v3679_v0  ;;  %3076 = vmatpush3.bf16.msra.mxu0 %v3309_v47 }
 0x7f2   : > { %3077 = vmatprep.subr.bf16.mxu0 %v3679_v0 }
 0x7f5   : > { %3078 = vmatpush3.bf16.msra.mxu0 %v3310_v48 }
 0x7f6   : > { %3089 = vmatprep.subr.bf16.mxu0 %v3679_v0 }
 0x7f8   : > { %3080 = vmatmul.mubr.msk.bf16.vlgmr.msra.gmra.mrb[32].mxu0 %vm975_vm1, %v1806_v50 }
 0x7f9   : > { %3091 = vmatprep.mubr.msk.bf16.mxu0 %vm3680_vm0, %v3679_v0 }
 0x7fe   : > { %v1974_v43 = vpop.permute.xlu0 %1973 }
 0x7ff   : > { %v1979_v46 = vsel %vm1127_vm2, %v1974_v43, 0 }
 0x802   : > { %v2085_v51 = vpop.permute.xlu0 %2084 }
 0x803   : > { %v2090_v53 = vsel %vm1127_vm2, %v2085_v51, 0 }
 0x806   : > { %v2195_v54 = vpop.permute.xlu0 %2194 }
 0x807   : > { %v2200_v56 = vsel %vm1127_vm2, %v2195_v54, 0 }
 0x8c3   : > { %v1743_v39 = vpop.f32.mrb[28].mxu0 }
 0x8c4   : > { %v1749_v40 = vmul.f32 0.17677669, %v1743_v39  ;;  %v3065_v41 = vpop.f32.mrb[29].mxu0 }
 0x8c5   : > { %v1746_v42 = vpop.f32.mrb[30].mxu0 }
 0x8c6   : > { %v1862_v44 = vpack.c.bf16 %v1749_v40, %v1749_v40  ;;  %v3066_v45 = vpop.f32.mrb[31].mxu0 }
 0x8c8   : > { %1970 = vrot.lane.b32.xlu1 %v1862_v44, %s3682_s5  ;;  %3086 = vmatmul.mubr.msk.bf16.vlgmr.msra.gmra.mrb[24].mxu1 %vm1127_vm2, %v1862_v44 }
 0x8c9   : > { %3096 = vmatpush3.bf16.xpose.msra.mxu1 %v1979_v46  ;;  %3097 = vmatprep.mubr.msk.bf16.mxu1 %vm3680_vm0, %v3679_v0 }
 0x8ca   : > { %3107 = vmatprep.subr.bf16.mxu1 %v3679_v0 }
 0x8cb   : > { %v1856_v4 = vpop.f32.mrb[32].mxu0 }
 0x8cc   : > { %2082 = vrot.lane.b32.xlu1 %v1862_v44, %s3681_s24  ;;  %v4265_v5 = vpack.c.bf16 %v1856_v4, %v1856_v4  ;;  %v3081_v6 = vpop.f32.mrb[33].mxu0 }
 0x8cd   : > { %v1859_v7 = vpop.f32.mrb[34].mxu0 }
 0x8ce   : > { %v3082_v8 = vpop.f32.mrb[35].mxu0  ;;  %v1927_v9 = vsel %vm1189_vm4, %v4265_v5, 0 }
 0x8cf   : > { %3090 = vmatpush3.bf16.msra.mxu0 %v1927_v9 }
 0x8d0   : > { %2192 = vrot.lane.b32.xlu1 %v1862_v44, %s3683_s25  ;;  %3101 = vmatprep.subr.bf16.mxu0 %v3679_v0 }
 0x93a   : > { %v1971_v52 = vpop.permute.xlu1 %1970 }
 0x93b   : > { %3098 = vmatmul.mubr.msk.bf16.vlgmr.msra.gmra.mrb[28].mxu1 %vm1127_vm2, %v1971_v52 }
 0x93c   : > { %3108 = vmatpush3.bf16.xpose.msra.mxu1 %v2090_v53  ;;  %3109 = vmatprep.mubr.msk.bf16.mxu1 %vm3680_vm0, %v3679_v0 }
 0x93d   : > { %3119 = vmatprep.subr.bf16.mxu1 %v3679_v0 }
 0x93e   : > { %v2083_v55 = vpop.permute.xlu1 %2082 }
 0x942   : > { %v2193_v57 = vpop.permute.xlu1 %2192 }
 0x943   : > { %3110 = vmatmul.mubr.msk.bf16.vlgmr.msra.gmra.mrb[32].mxu1 %vm1127_vm2, %v2083_v55 }
 0x944   : > { %3120 = vmatpush3.bf16.xpose.msra.mxu1 %v2200_v56  ;;  %3121 = vmatprep.mubr.msk.bf16.mxu1 %vm3680_vm0, %v3679_v0 }
 0x945   : > { %3131 = vmatprep.subr.bf16.mxu1 %v3679_v0 }
 0x94b   : > { %3122 = vmatmul.mubr.msk.bf16.vlgmr.msra.gmra.mrb[36].mxu1 %vm1127_vm2, %v2193_v57 }
 0x94c   : > { %3135 = vmatprep.mubr.msk.bf16.mxu1 %vm3680_vm0, %v3679_v0 }
 0x99b   : > { %v1905_v60 = vpop.f32.mrb[24].mxu1 }
 0x99c   : > { %v1906_v61 = vadd.f32 %v1905_v60, %v944_v59  ;;  %v3087_v62 = vpop.f32.mrb[25].mxu1 }
 0x99d   : > { %v1908_v63 = vpop.f32.mrb[26].mxu1 }
 0x99e   : > { %v3088_v1 = vpop.f32.mrb[27].mxu1  ;;  %v1911_v2 = vsel %vm1127_vm2, %v1906_v61, -inf }
 0x99f   : > { %1912 = vmax.xlane.f32.xlu0 %v1911_v2 }
 0xa0e   : > { %v2015_v10 = vpop.f32.mrb[28].mxu1 }
 0xa0f   : > { %v2016_v11 = vadd.f32 %v2015_v10, %v944_v59  ;;  %v3099_v12 = vpop.f32.mrb[29].mxu1 }
 0xa10   : > { %v2018_v13 = vpop.f32.mrb[30].mxu1  ;;  %v3311_v12 = vld [vmem:[%s4437_s15] sm:$0xff]  }
 0xa11   : > { %v3100_v14 = vpop.f32.mrb[31].mxu1  ;;  %v2021_v15 = vsel %vm1127_vm2, %v2016_v11, -inf  ;;  %3132 = vmatpush3.bf16.msra.mxu1 %v3311_v12 }
 0xa12   : > { %2022 = vmax.xlane.f32.xlu1 %v2021_v15  ;;  %3133 = vmatprep.subr.bf16.mxu1 %v3679_v0 }
 0xa16   : > { %v2126_v16 = vpop.f32.mrb[32].mxu1 }
 0xa17   : > { %v2127_v17 = vadd.f32 %v2126_v16, %v944_v59  ;;  %v3111_v18 = vpop.f32.mrb[33].mxu1 }
 0xa18   : > { %v2129_v19 = vpop.f32.mrb[34].mxu1 }
 0xa19   : > { %v3112_v3 = vpop.f32.mrb[35].mxu1  ;;  %v2132_v20 = vsel %vm1127_vm2, %v2127_v17, -inf }
 0xa1a   : > { %2133 = vmax.xlane.f32.xlu0 %v2132_v20 }
 0xa1e   : > { %v2236_v21 = vpop.f32.mrb[36].mxu1 }
 0xa1f   : > { %v2237_v22 = vadd.f32 %v2236_v21, %v944_v59  ;;  %v3123_v23 = vpop.f32.mrb[37].mxu1 }
 0xa20   : > { %v2239_v24 = vpop.f32.mrb[38].mxu1 }
 0xa21   : > { %v3124_v25 = vpop.f32.mrb[39].mxu1  ;;  %v2242_v26 = vsel %vm1127_vm2, %v2237_v22, -inf }
 0xa22   : > { %2243 = vmax.xlane.f32.xlu0 %v2242_v26 }
 0xa2c   : > { %v1913_v27 = vpop.xlane.xlu0 %1912 }
 0xa2d   : > { %v1914_v28 = vsub.f32 %v1906_v61, %v1913_v27 }
 0xa2f   : > { %v1915_v29 = vmul.f32 1.442695, %v1914_v28 }
 0xa31   : > { %3341 = vpow2.f32 %v1915_v29 }
 0xa3b   : > { %v3342_v30 = vpop.eup %3341 }
 0xa3c   : > { %v1917_v32 = vsel %vm1127_vm2, %v3342_v30, 0.0 }
 0xa3d   : > { %1918 = vadd.xlane.f32.xlu1 %v1917_v32 }
 0xa4e   : > { %2034 = vrot.lane.b32.xlu1 %v4265_v5, %s3682_s5  ;;  %s4520_s5 = sld [smem:[#allocation42_spill]] }
 0xa9f   : > { %v2023_v33 = vpop.xlane.xlu1 %2022 }
 0xaa0   : > { %v2024_v34 = vsub.f32 %v2016_v11, %v2023_v33  ;;  %v2886_v33 = vld [vmem:[#allocation11] ss:$0 sm:$0xff] }
 0xaa2   : > { %v2025_v35 = vmul.f32 1.442695, %v2024_v34 }
 0xaa4   : > { %3343 = vpow2.f32 %v2025_v35 }
 0xaa7   : > { %v2134_v36 = vpop.xlane.xlu0 %2133 }
 0xaa8   : > { %v2135_v37 = vsub.f32 %v2127_v17, %v2134_v36  ;;  %v3312_v17 = vld [vmem:[%s4437_s15 + $0x8] sm:$0xff]  }
 0xaa9   : > { %3134 = vmatpush3.bf16.msra.mxu1 %v3312_v17 }
 0xaaa   : > { %v2136_v38 = vmul.f32 1.442695, %v2135_v37  ;;  %3147 = vmatprep.subr.bf16.mxu1 %v3679_v0 }
 0xaac   : > { %3345 = vpow2.f32 %v2136_v38 }
 0xaae   : > { %v3344_v39 = vpop.eup %3343 }
 0xaaf   : > { %v2244_v40 = vpop.xlane.xlu0 %2243  ;;  %v2027_v41 = vsel %vm1127_vm2, %v3344_v39, 0.0 }
 0xab0   : > { %v2245_v42 = vsub.f32 %v2237_v22, %v2244_v40  ;;  %2028 = vadd.xlane.f32.xlu0 %v2027_v41 }
 0xab2   : > { %v2246_v43 = vmul.f32 1.442695, %v2245_v42 }
 0xab4   : > { %3347 = vpow2.f32 %v2246_v43 }
 0xab6   : > { %v3346_v44 = vpop.eup %3345 }
 0xab7   : > { %v2138_v45 = vsel %vm1127_vm2, %v3346_v44, 0.0 }
 0xab8   : > { %2139 = vadd.xlane.f32.xlu1 %v2138_v45 }
 0xabe   : > { %v3348_v46 = vpop.eup %3347 }
 0xabf   : > { %v2248_v47 = vsel %vm1127_vm2, %v3348_v46, 0.0 }
 0xac0   : > { %2249 = vadd.xlane.f32.xlu0 %v2248_v47  ;;  %v3314_v47 = vld [vmem:[%s4441_s19 + $0x8] sm:$0xff]  }
 0xac9   : > { %2254 = vrot.lane.b32.xlu1 %v4265_v5, %s3683_s25 }
 0xaca   : > { %v1919_v48 = vpop.xlane.xlu1 %1918 }
 0xacb   : > { %3349 = vrcp.f32 %v1919_v48  ;;  %v3316_v48 = vld [vmem:[%s4443_s21 + $0x8] sm:$0xff]  }
 0xace   : > { %v2035_v50 = vpop.permute.xlu1 %2034 }
 0xacf   : > { %v2040_v53 = vsel %vm1189_vm4, %v2035_v50, 0  ;;  %v3318_v50 = vld [vmem:[%s4443_s21 + $0x18] sm:$0xff]  }
 0xad5   : > { %v3350_v49 = vpop.eup %3349 }
 0xad6   : > { %v1921_v51 = vmul.f32 %v3350_v49, %v3342_v30  ;;  %2144 = vrot.lane.b32.xlu0 %v4265_v5, %s3681_s24  ;;  %v3317_v49 = vld [vmem:[%s4443_s21 + $0x10] sm:$0xff]   ;;  %s3585_s24 = scalar_lea.vmem %s4381_s16, 128 }
 0xad7   : > { %p3586_p8 = scmp.ne.s32.totalorder %s4381_s16, %s3585_s24 }
 0xad8   : > { %v1922_v52 = vpack.c.bf16 %v1921_v51, %v1921_v51  ;;  %v3319_v51 = vld [vmem:[%s4443_s21 + $0x20] sm:$0xff]  }
 0xad9   : > { %p3587_p13 = pnand %p3586_p8, %p4523_p11 }
 0xada   : > { %3092 = vmatmul.mubr.msk.bf16.vlgmr.msra.gmra.mrb[36].mxu0 %vm1127_vm2, %v1922_v52  ;;  %v3320_v52 = vld [vmem:[%s4443_s21 + $0x28] sm:$0xff]  }
 0xadb   : > { %3102 = vmatpush3.bf16.msra.mxu0 %v2040_v53  ;;  %3103 = vmatprep.mubr.msk.bf16.mxu0 %vm3680_vm0, %v3679_v0  ;;  %p3588_p1 = pneg %p3587_p13 }
 0xadc   : > { %3113 = vmatprep.subr.bf16.mxu0 %v3679_v0 }
 0xb3d   : > { %v2029_v54 = vpop.xlane.xlu0 %2028 }
 0xb3e   : > { %3351 = vrcp.f32 %v2029_v54 }
 0xb45   : > { %v2140_v55 = vpop.xlane.xlu1 %2139 }
 0xb46   : > { %3353 = vrcp.f32 %v2140_v55 }
 0xb48   : > { %v3352_v56 = vpop.eup %3351 }
 0xb49   : > { %v2031_v57 = vmul.f32 %v3352_v56, %v3344_v39  ;;  %v2255_v1 = vpop.permute.xlu1 %2254 }
 0xb4a   : > { %v2260_v4 = vsel %vm1189_vm4, %v2255_v1, 0  ;;  %v3322_v1 = vld [vmem:[%s4443_s21 + $0x38] sm:$0xff]  }
 0xb4b   : > { %v2032_v58 = vpack.c.bf16 %v2031_v57, %v2031_v57  ;;  %v2890_v57 = vld [vmem:[#allocation13] ss:$0 sm:$0xff] }
 0xb4d   : > { %v2250_v59 = vpop.xlane.xlu0 %2249  ;;  %3104 = vmatmul.mubr.msk.bf16.vlgmr.msra.gmra.mrb[40].mxu0 %vm1127_vm2, %v2032_v58 }
 0xb4e   : > { %3355 = vrcp.f32 %v2250_v59  ;;  %3115 = vmatprep.mubr.msk.bf16.mxu0 %vm3680_vm0, %v3679_v0  ;;  %v2891_v59 = vld [vmem:[#allocation14] ss:$0 sm:$0xff] }
 0xb50   : > { %v3354_v60 = vpop.eup %3353 }
 0xb51   : > { %v2142_v61 = vmul.f32 %v3354_v60, %v3346_v44  ;;  %v2145_v62 = vpop.permute.xlu0 %2144 }
 0xb52   : > { %v2150_v63 = vsel %vm1189_vm4, %v2145_v62, 0 }
 0xb53   : > { %3114 = vmatpush3.bf16.msra.mxu0 %v2150_v63  ;;  %v2143_v2 = vpack.c.bf16 %v2142_v61, %v2142_v61  ;;  %v3321_v63 = vld [vmem:[%s4443_s21 + $0x30] sm:$0xff]  }
 0xb54   : > { %3125 = vmatprep.subr.bf16.mxu0 %v3679_v0 }
 0xb56   : > { %3116 = vmatmul.mubr.msk.bf16.vlgmr.msra.gmra.mrb[44].mxu0 %vm1127_vm2, %v2143_v2  ;;  %v2892_v2 = vld [vmem:[%s4442_s20] ss:$0 sm:$0xff] }
 0xb57   : > { %3126 = vmatpush3.bf16.msra.mxu0 %v2260_v4  ;;  %3127 = vmatprep.mubr.msk.bf16.mxu0 %vm3680_vm0, %v3679_v0 }
 0xb58   : > { %v3356_v5 = vpop.eup %3355  ;;  %3139 = vmatprep.subr.bf16.mxu0 %v3679_v0 }
 0xb59   : > { %v2252_v6 = vmul.f32 %v3356_v5, %v3348_v46  ;;  %v3313_v46 = vld [vmem:[%s4441_s19] sm:$0xff]  }
 0xb5b   : > { %v2253_v7 = vpack.c.bf16 %v2252_v6, %v2252_v6 }
 0xb5e   : > { %3128 = vmatmul.mubr.msk.bf16.vlgmr.msra.gmra.mrb[48].mxu0 %vm1127_vm2, %v2253_v7 }
 0xb5f   : > { %3143 = vmatprep.mubr.msk.bf16.mxu0 %vm3680_vm0, %v3679_v0  ;;  %3140 = vmatpush3.bf16.msra.mxu0 %v3313_v46 }
 0xb60   : > { %3141 = vmatprep.subr.bf16.mxu0 %v3679_v0 }
 0xb63   : > { %3142 = vmatpush3.bf16.msra.mxu0 %v3314_v47 }
 0xbad   : > { %v1963_v8 = vpop.f32.mrb[36].mxu0 }
 0xbae   : > { %v3093_v9 = vpop.f32.mrb[37].mxu0 }
 0xbaf   : > { %v1966_v10 = vpop.f32.mrb[38].mxu0 }
 0xbb0   : > { %v3094_v11 = vpop.f32.mrb[39].mxu0 }
 0xc20   : > { %v2076_v13 = vpop.f32.mrb[40].mxu0 }
 0xc21   : > { %2303 = vrot.lane.b32.xlu1 %v2076_v13, %s3684_s6  ;;  %v3105_v14 = vpop.f32.mrb[41].mxu0 }
 0xc22   : > { %v2079_v15 = vpop.f32.mrb[42].mxu0 }
 0xc23   : > { %v3106_v16 = vpop.f32.mrb[43].mxu0 }
 0xc29   : > { %v2186_v18 = vpop.f32.mrb[44].mxu0 }
 0xc2a   : > { %2307 = vrot.lane.b32.xlu0 %v2186_v18, %s3685_s8  ;;  %v3117_v19 = vpop.f32.mrb[45].mxu0  ;;  %s4521_s8 = sld [smem:[#allocation43_spill]] }
 0xc2b   : > { %v2189_v3 = vpop.f32.mrb[46].mxu0 }
 0xc2c   : > { %v3118_v20 = vpop.f32.mrb[47].mxu0 }
 0xc31   : > { %v2296_v21 = vpop.f32.mrb[48].mxu0 }
 0xc32   : > { %2311 = vrot.lane.b32.xlu1 %v2296_v21, %s3686_s1  ;;  %v3129_v22 = vpop.f32.mrb[49].mxu0  ;;  %s2908_s1 = sshll.u32 %s3839_s7, 7  ;;  %s3687_s7 = smov [#allocation16]  }
 0xc33   : > { %v2299_v23 = vpop.f32.mrb[50].mxu0  ;;  %s4379_s3 = scalar_lea.hbm %s4522_s28, %s2908_s1  ;;  %s3589_s26 = sshll.u32 %s3687_s7, 4  ;;  %s3590_s26 = int_to_ptr.vmem [resolvable:$false] %s3589_s26 }
 0xc34   : > { %v3130_v24 = vpop.f32.mrb[51].mxu0  ;;  %p3592_p0 = scmp.lt.s32.totalorder %s4381_s16, %s3590_s26 }
 0xc93   : > { %v2304_v25 = vpop.permute.xlu1 %2303 }
 0xc94   : > { %v2314_v27 = vsel %vm1127_vm2, %v1963_v8, %v2304_v25 }
 0xc9c   : > { %v2308_v26 = vpop.permute.xlu0 %2307 }
 0xc9d   : > { %v2315_v28 = vsel %vm1579_vm5, %v2314_v27, %v2308_v26  ;;  %v2905_v26 = vld [vmem:[%s4520_s5] ss:$0 sm:$0xff]  ;;  %s3591_s5 = scalar_lea.vmem %s3590_s26, 256 }
 0xc9e   : > { %p3593_p6 = scmp.lt.s32.totalorder %s3591_s5, %s3585_s24 }
 0xca0   : > { %p3594_p5 = por %p3593_p6, %p3592_p0 }
 0xca2   : > { %p3595_p9 = pnand %p3594_p5, %p3588_p1 }
 0xca4   : > { %v2312_v29 = vpop.permute.xlu1 %2311 }
 0xca5   : > { %v2316_v30 = vsel %vm1581_vm6, %v2315_v28, %v2312_v29  ;;  %v2906_v28 = vld [vmem:[%s4521_s8] ss:$0 sm:$0xff] }
 0xca6   : > { %v2317_v32 = vpack.c.bf16 %v2316_v30, %v2316_v30 }
 0xca8   : > { %3136 = vmatmul.mubr.msk.bf16.vlgmr.msra.gmra.mrb[40].mxu1 %vm975_vm1, %v2317_v32 }
 0xca9   : > { %3163 = vmatprep.mubr.msk.bf16.mxu1 %vm3680_vm0, %v3679_v0 }
 0xd7b   : > { %v2373_v34 = vpop.f32.mrb[40].mxu1 }
 0xd7c   : > { %v2374_v35 = vadd.f32 %v2886_v33, %v2373_v34  ;;  %v3137_v36 = vpop.f32.mrb[41].mxu1 }
 0xd7d   : > { %v2376_v37 = vpop.f32.mrb[42].mxu1 }
 0xd7e   : > { %v3138_v38 = vpop.f32.mrb[43].mxu1  ;;  %v2379_v39 = vadd.f32 %v2374_v35, %v4217_v31  ;;  %v3315_v31 = vld [vmem:[%s4443_s21] sm:$0xff]  }
 0xd7f   : > { %3148 = vmatpush3.bf16.msra.mxu1 %v3315_v31 }
 0xd80   : > { %v2382_v40 = vsel %vm975_vm1, %v2379_v39, 0.0  ;;  %3149 = vmatprep.subr.bf16.mxu1 %v3679_v0 }
 0xd81   : > { %2383 = vadd.xlane.f32.xlu0 %v2382_v40 }
 0xd83   : > { %3150 = vmatpush3.bf16.msra.mxu1 %v3316_v48 }
 0xd84   : > { %3151 = vmatprep.subr.bf16.mxu1 %v3679_v0 }
 0xd87   : > { %3152 = vmatpush3.bf16.msra.mxu1 %v3317_v49 }
 0xd88   : > { %3153 = vmatprep.subr.bf16.mxu1 %v3679_v0 }
 0xd8b   : > { %3154 = vmatpush3.bf16.msra.mxu1 %v3318_v50 }
 0xd8c   : > { %3155 = vmatprep.subr.bf16.mxu1 %v3679_v0 }
 0xd8f   : > { %3156 = vmatpush3.bf16.msra.mxu1 %v3319_v51 }
 0xd90   : > { %3157 = vmatprep.subr.bf16.mxu1 %v3679_v0 }
 0xd93   : > { %3158 = vmatpush3.bf16.msra.mxu1 %v3320_v52 }
 0xd94   : > { %3159 = vmatprep.subr.bf16.mxu1 %v3679_v0 }
 0xd97   : > { %3160 = vmatpush3.bf16.msra.mxu1 %v3321_v63 }
 0xd98   : > { %3161 = vmatprep.subr.bf16.mxu1 %v3679_v0  ;;  %v2896_v0 = vld [vmem:[%s4444_s22] ss:$0 sm:$0xff] }
 0xd9b   : > { %3162 = vmatpush3.bf16.msra.mxu1 %v3322_v1 }
 0xe0e   : > { %v2384_v41 = vpop.xlane.xlu0 %2383 }
 0xe0f   : > { %v2385_v42 = vmul.f32 0.03125, %v2384_v41 }
 0xe11   : > { %v2386_v43 = vsub.f32 %v2379_v39, %v2385_v42 }
 0xe13   : > { %v2387_v44 = vmul.f32 %v2386_v43, %v2386_v43 }
 0xe15   : > { %v2388_v45 = vsel %vm975_vm1, %v2387_v44, 0.0 }
 0xe16   : > { %2389 = vadd.xlane.f32.xlu1 %v2388_v45 }
 0xea3   : > { %v2390_v53 = vpop.xlane.xlu1 %2389 }
 0xea4   : > { %v2391_v54 = vmul.f32 0.03125, %v2390_v53 }
 0xea6   : > { %v2392_v55 = vadd.f32 1e-05, %v2391_v54 }
 0xea8   : > { %3357 = vrsqrt.f32 %v2392_v55 }
 0xeb2   : > { %v3358_v56 = vpop.eup %3357 }
 0xeb3   : > { %v2394_v58 = vmul.f32 %v3358_v56, %v2386_v43 }
 0xeb5   : > { %v2401_v60 = vmul.f32 %v2890_v57, %v2394_v58 }
 0xeb7   : > { %v2408_v61 = vadd.f32 %v2891_v59, %v2401_v60 }
 0xeb9   : > { %v2409_v62 = vpack.c.bf16 %v2408_v61, %v2408_v61 }
 0xebb   : > { %3144 = vmatmul.mubr.msk.bf16.vlgmr.msra.gmra.mrb[52].mxu0 %vm975_vm1, %v2409_v62 }
 0xf8e   : > { %v2470_v4 = vpop.f32.mrb[52].mxu0 }
 0xf8f   : > { %v2471_v5 = vadd.f32 %v2892_v2, %v2470_v4  ;;  %v3145_v6 = vpop.f32.mrb[53].mxu0 }
 0xf90   : > { %v2473_v7 = vpop.f32.mrb[54].mxu0 }
 0xf91   : > { %v2476_v8 = vmax.f32 %v2471_v5, 0.0  ;;  %v3146_v9 = vpop.f32.mrb[55].mxu0 }
 0xf93   : > { %v2477_v10 = vpack.c.bf16 %v2476_v8, %v2476_v8 }
 0xf95   : > { %3164 = vmatmul.mubr.bf16.vlgmr.msra.gmra.mrb[44].mxu1 %v2477_v10 }
0x1068   : > { %v2583_v11 = vpop.f32.mrb[44].mxu1 }
0x1069   : > { %v2584_v12 = vadd.f32 %v2896_v0, %v2583_v11  ;;  %v3165_v13 = vpop.f32.mrb[45].mxu1 }
0x106a   : > { %v2586_v14 = vpop.f32.mrb[46].mxu1 }
0x106b   : > { %v3166_v15 = vpop.f32.mrb[47].mxu1  ;;  %v2589_v16 = vadd.f32 %v2584_v12, %v2408_v61 }
0x106d   : > { %v2592_v17 = vsel %vm975_vm1, %v2589_v16, 0.0 }
0x106e   : > { %2593 = vadd.xlane.f32.xlu0 %v2592_v17 }
0x10fb   : > { %v2594_v18 = vpop.xlane.xlu0 %2593 }
0x10fc   : > { %v2595_v19 = vmul.f32 0.03125, %v2594_v18 }
0x10fe   : > { %v2596_v3 = vsub.f32 %v2589_v16, %v2595_v19 }
0x1100   : > { %v2597_v20 = vmul.f32 %v2596_v3, %v2596_v3 }
0x1102   : > { %v2598_v21 = vsel %vm975_vm1, %v2597_v20, 0.0 }
0x1103   : > { %2599 = vadd.xlane.f32.xlu0 %v2598_v21 }
0x1190   : > { %v2600_v22 = vpop.xlane.xlu0 %2599 }
0x1191   : > { %v2601_v23 = vmul.f32 0.03125, %v2600_v22 }
0x1193   : > { %v2602_v24 = vadd.f32 1e-05, %v2601_v23 }
0x1195   : > { %3359 = vrsqrt.f32 %v2602_v24 }
0x119f   : > { %v3360_v25 = vpop.eup %3359 }
0x11a0   : > { %v2604_v27 = vmul.f32 %v3360_v25, %v2596_v3 }
0x11a2   : > { %v2611_v29 = vmul.f32 %v2905_v26, %v2604_v27 }
0x11a4   : > { %v2618_v30 = vadd.f32 %v2906_v28, %v2611_v29 }
0x11a6   : > { %2619 = vst.msk [vmem:[%s914_s23] sm:$0xff] %vm975_vm1, %v2618_v30 }
0x11a7   : > { %3598 = shalt.err (!%p3595_p9)
}
0x11a8   : > { %s3599_s10 = scalar_lea.hbm %s4379_s3, 128  ;;  %s3603_s8 = scalar_lea.hbm %s4522_s28, 256 }
0x11a9   : > { %p3600_p12 = scmp.ne.s32.totalorder %s4379_s3, %s3599_s10  ;;  %p3604_p3 = scmp.lt.u32.totalorder %s4379_s3, %s4522_s28 }
0x11aa   : > { %p3605_p4 = scmp.lt.u32.totalorder %s3603_s8, %s3599_s10  ;;  %p3607_p8 = scmp.lt.u32.totalorder %s3599_s10, %s4379_s3 }
0x11ab   : > { %p3601_p10 = pnand %p3600_p12, %p4523_p11 }
0x11ac   : > { %p3606_p7 = por %p3605_p4, %p3604_p3 }
0x11ad   : > { %p3602_p2 = pneg %p3601_p10 }
0x11ae   : > { %p3608_p13 = por %p3607_p8, %p3606_p7 }
0x11b0   : > { %p3609_p1 = pnand %p3608_p13, %p3602_p2 }
0x11b2   : > { %3612 = shalt.err (!%p3609_p1)
}
0x11b3   : > { %3199 = dma.vmem_to_hbm [thread:$0]  (%p4523_p11), %s4381_s16, 128, %s4379_s3, %s2621_s9  }
0x11b4 PF: > { %s4524_s29 = sld [smem:[#allocation25_spill]]  ;;  %s4525_s30 = sld [smem:[#allocation23_spill]] }
0x11b5   : > { %s4526_s24 = sld [smem:[#allocation28_spill]] }
0x11ba   : > { %p3246_p0 = scmp.ge.s32.totalorder %s4524_s29, 2  ;;  %s2646_s7 = sand.u32 1, %s4525_s30  }
0x11bb   : > { %p4527_p6 = scmp.ne.s32.totalorder %s4526_s24, 0  ;;  %s2647_s26 = scalar_lea.sflag [#allocation4], %s2646_s7 }
0x11bd   : > { %p3227_p5 = pnand %p3246_p0, %p4527_p6 }
0x11bf   : > { %3650 = dma.done.wait (!%p3227_p5), %s2647_s26, 128  }
0x11c0   : > { %3652 = vsyncadd (!%p3227_p5), %s2647_s26, 4294967168  ;;  %s4528_s30 = sld [smem:[#allocation26_spill]]  ;;  %s4529_s5 = sld [smem:[#allocation24_spill]] }
0x11c1   : > { %s4530_s6 = sld [smem:[#allocation27_spill]]  ;;  %s4531_s29 = smov %s3659_s2 }
0x11c6   : > { %p40_p9 = scmp.ge.s32.totalorder %s4528_s30, 4   ;;  %s4532_s2 = smov %s4529_s5 }
0x11c8   :  { %42 = sbr.rel (!%p40_p9) target bundleno = 25 (0x19), region = 200 }
0x11cf   :  { %2652 = vsyncpa [#allocation3], 1 }
0x11d0   :  { %2654 = vsyncpa [#allocation3 + $0x1], 1 }
0x11d1   :  { %2655 = vsyncpa [#allocation6], 1 }
0x11d2   :  { %2656 = vsyncpa [#allocation9], 1 }
0x11d3   :  { %2657 = vsyncpa [#allocation12], 1 }
0x11d4   :  { %2658 = vsyncpa [#allocation15], 1 }
0x11d5   :  { %2659 = vsyncpa [#allocation4], 1 }
0x11d6   :  { %2661 = vsyncpa [#allocation4 + $0x1], 1 }

</bundles_post_ra>
